<compile_context>
chip_gen: v6e
topology: v6e:2x2x1
jax: 0.10.0
libtpu: 0.0.40
codegen_flags: <defaults>
</compile_context>

<pallas_src>
import collections
import functools

import jax
import jax.numpy as jnp
from jax.experimental import pallas as pl
from jax.experimental.pallas import tpu as pltpu


_Layer = collections.namedtuple(
    "_Layer",
    ["kind", "kw", "s", "p", "n_q", "C_in", "C_out", "act",
     "T_in", "T_out", "T_full", "P_l", "P_r"],
)


def _apply_act(y, act, alpha):
    if act == "prelu":
        return jnp.where(y >= 0.0, y, alpha * y)
    if act == "tanh":
        return jnp.tanh(y)
    return y


# ----------------------------------------------------------------------------
# Fused kernel: runs every encoder/decoder block for one batch element.
# ----------------------------------------------------------------------------
def _ae_se_kernel(x_ref, *refs, layers):
    o_ref = refs[-3]
    stage_in = refs[-2]     # staging buffer for (reflect/zero-)padded layer inputs
    stage_out = refs[-1]    # staging buffer for interleaved transposed-conv output
    prm = refs[:-3]

    h = x_ref[0].astype(jnp.float32)                   # (T0, C_in0), time-major

    pi = 0
    for L in layers:
        w_ref = prm[pi]                                # (kw, C_in, C_out) per-tap mats
        b = prm[pi + 1][...]                           # (1, C_out)
        alpha = prm[pi + 2][...]                       # (1, C_out)
        pi += 3
        Ci, Co = L.C_in, L.C_out

        if L.kind == "conv":
            # ---- GConv1DBlock: reflect-pad -> strided Conv1d -> PReLU ----
            T_in, kw, s = L.T_in, L.kw, L.s
            P_l, P_r, T_out = L.P_l, L.P_r, L.T_out
            # stage the reflect-padded input (rows = time, cols = channels)
            stage_in[P_l:P_l + T_in, 0:Ci] = h
            for i in range(P_l):                       # left reflection: x[P_l] .. x[1]
                stage_in[i:i + 1, 0:Ci] = h[P_l - i:P_l - i + 1, :]
            for j in range(P_r):                       # right reflection: x[T-2], x[T-3], ...
                d = P_l + T_in + j
                stage_in[d:d + 1, 0:Ci] = h[T_in - 2 - j:T_in - 1 - j, :]
            acc = jnp.zeros((T_out, Co), jnp.float32) + b
            for k in range(kw):                        # per-tap matmul accumulate (no im2col)
                if s > 1:
                    xk = stage_in[pl.ds(k, T_out, stride=s), 0:Ci]
                else:
                    xk = stage_in[k:k + T_out, 0:Ci]
                wk = w_ref[k]                          # (Ci, Co) = W[co, ci, k]^T
                if Ci == 1:
                    acc = acc + xk * wk                # avoid a K=1 matmul
                else:
                    acc = acc + jnp.dot(xk, wk, preferred_element_type=jnp.float32)
            h = _apply_act(acc, L.act, alpha)

        else:
            # ---- GDeconv1DBlock: polyphase ConvTranspose1d -> (trim) -> act ----
            # y[n] = b + sum_{ci,t,k : s*t + k - p = n} W[ci,co,k] * x[ci,t]
            # phase r = (n+p) % s:  y_r[m] = b + sum_q W[.,.,s*q+r] . x[m-q]
            T_in, kw, s, p, n_q = L.T_in, L.kw, L.s, L.p, L.n_q
            T_full = L.T_full
            Z = n_q                                    # zero halo large enough for all taps
            zero = jnp.zeros((Z, Ci), jnp.float32)
            stage_in[0:Z, 0:Ci] = zero
            stage_in[Z:Z + T_in, 0:Ci] = h
            stage_in[Z + T_in:Z + T_in + Z, 0:Ci] = zero
            for r in range(s):
                m_lo = -(-(p - r) // s)                # ceil((p - r) / s)
                m_hi = (T_full - 1 + p - r) // s
                cnt = m_hi - m_lo + 1
                if cnt <= 0:
                    continue
                acc = jnp.zeros((cnt, Co), jnp.float32) + b
                for q in range(n_q):
                    k = s * q + r
                    if k >= kw:
                        continue
                    st = Z + m_lo - q
                    xq = stage_in[st:st + cnt, 0:Ci]   # dense slice: no zero-dilation FLOPs
                    wk = w_ref[k]                      # (Ci, Co) = W[ci, co, k]
                    if Ci == 1:
                        acc = acc + xq * wk
                    else:
                        acc = acc + jnp.dot(xq, wk, preferred_element_type=jnp.float32)
                y_r = _apply_act(acc, L.act, alpha)
                n0 = s * m_lo + r - p                  # first output index of this phase
                if s > 1:
                    stage_out[pl.ds(n0, cnt, stride=s), 0:Co] = y_r   # interleave phases
                else:
                    stage_out[n0:n0 + cnt, 0:Co] = y_r
            h = stage_out[0:L.T_out, 0:Co]             # drops last sample if kw is odd

    o_ref[0] = h.astype(o_ref.dtype)


# ----------------------------------------------------------------------------
# Static planning: per-layer shapes + VMEM-friendly parameter layouts.
# ----------------------------------------------------------------------------
def _build_plan(params, cfg, T0):
    layers, flat = [], []
    T_cur = T0
    stage_rows, c_max = 8, 1

    for (W, b, alpha), kw, s in zip(params["enc"], cfg["kwidth"], cfg["poolings"]):
        Co, Ci, _ = W.shape                              # PyTorch Conv1d: (C_out, C_in, kw)
        P_l, P_r = (kw // 2 - 1, kw // 2) if s > 1 else (kw // 2, kw // 2)
        T_pad = T_cur + P_l + P_r
        T_out = (T_pad - kw) // s + 1
        layers.append(_Layer("conv", kw, s, 0, 0, Ci, Co, "prelu",
                             T_cur, T_out, 0, P_l, P_r))
        flat += [jnp.transpose(W, (2, 1, 0)).astype(jnp.float32),    # (kw, Ci, Co)
                 b.reshape(1, Co).astype(jnp.float32),
                 alpha.reshape(1, Co).astype(jnp.float32)]
        stage_rows = max(stage_rows, T_pad)
        c_max = max(c_max, Ci, Co)
        T_cur = T_out

    n_dec = len(params["dec"])
    for i, ((W, b, alpha), kw, s) in enumerate(
            zip(params["dec"], cfg["dec_kwidth"], cfg["dec_poolings"]), start=1):
        Ci, Co, _ = W.shape                              # ConvTranspose1d: (C_in, C_out, kw)
        p = max(0, (s - kw) // -2)                       # same padding rule as the module
        n_q = -(-kw // s)                                # taps per polyphase branch
        T_full = (T_cur - 1) * s + kw - 2 * p
        T_out = T_full - (1 if kw % 2 != 0 else 0)       # odd-kwidth trim
        act = "tanh" if i >= n_dec else "prelu"
        layers.append(_Layer("deconv", kw, s, p, n_q, Ci, Co, act,
                             T_cur, T_out, T_full, 0, 0))
        flat += [jnp.transpose(W, (2, 0, 1)).astype(jnp.float32),    # (kw, Ci, Co)
                 b.reshape(1, Co).astype(jnp.float32),
                 alpha.reshape(1, Co).astype(jnp.float32)]
        stage_rows = max(stage_rows, T_cur + 2 * n_q, T_full)
        c_max = max(c_max, Ci, Co)
        T_cur = T_out

    T_stage = (stage_rows + 7) // 8 * 8
    C_final = layers[-1].C_out
    return tuple(layers), flat, T_cur, C_final, T_stage, max(c_max, 8)


# ----------------------------------------------------------------------------
# AE_SE forward (public API: NCL in / NCL out, like the PyTorch module)
# ----------------------------------------------------------------------------
def ae_se_forward(x_ncl, params, cfg):
    B, C0, T0 = x_ncl.shape
    x_btc = jnp.transpose(x_ncl, (0, 2, 1)).astype(jnp.float32)      # (B, T, C)
    layers, flat, T_fin, C_fin, T_stage, c_max = _build_plan(params, cfg, T0)

    def _const(nd):
        return lambda b: (0,) * nd

    kernel = functools.partial(_ae_se_kernel, layers=layers)
    out_btc = pl.pallas_call(
        kernel,
        out_shape=jax.ShapeDtypeStruct((B, T_fin, C_fin), jnp.float32),
        grid_spec=pltpu.PrefetchScalarGridSpec(
            num_scalar_prefetch=0,
            grid=(B,),                                               # one seq per step
            in_specs=[pl.BlockSpec((1, T0, C0), lambda b: (b, 0, 0))]
                     + [pl.BlockSpec(a.shape, _const(a.ndim)) for a in flat],
            out_specs=pl.BlockSpec((1, T_fin, C_fin), lambda b: (b, 0, 0)),
            scratch_shapes=[pltpu.VMEM((T_stage, c_max), jnp.float32),
                            pltpu.VMEM((T_stage, c_max), jnp.float32)],
        ),
        compiler_params=pltpu.CompilerParams(
            dimension_semantics=("parallel",)),                      # megacore sharding
    )(x_btc, *flat)
    return jnp.transpose(out_btc, (0, 2, 1))                         # NTC -> NCL


# ----------------------------------------------------------------------------
# Deterministic parameter init (matches PyTorch layer shapes; PReLU init=0)
# ----------------------------------------------------------------------------
def init_params(key, inputs, fmaps, kwidth, dec_fmaps, dec_kwidth):
    params = {"enc": [], "dec": []}
    in_ch = inputs
    for fmap, kw in zip(fmaps, kwidth):
        key, k1, k2 = jax.random.split(key, 3)
        scale = 1.0 / float(jnp.sqrt(in_ch * kw))
        W = jax.random.uniform(k1, (fmap, in_ch, kw), jnp.float32, -scale, scale)
        b = jax.random.uniform(k2, (fmap,), jnp.float32, -scale, scale)
        alpha = jnp.zeros((fmap,), jnp.float32)          # nn.PReLU(fmap, init=0)
        params["enc"].append((W, b, alpha))
        in_ch = fmap
    for fmap, kw in zip(dec_fmaps, dec_kwidth):
        key, k1, k2 = jax.random.split(key, 3)
        scale = 1.0 / float(jnp.sqrt(in_ch * kw))
        W = jax.random.uniform(k1, (in_ch, fmap, kw), jnp.float32, -scale, scale)
        b = jax.random.uniform(k2, (fmap,), jnp.float32, -scale, scale)
        alpha = jnp.zeros((fmap,), jnp.float32)
        params["dec"].append((W, b, alpha))
        in_ch = fmap
    return params


if __name__ == "__main__":
    # Small config: AE_SE(inputs=1, fmaps=[8,16], kwidth=[8,8], poolings=[2,2],
    #                     dec_fmaps=[8,1], dec_kwidth=[8,8], dec_poolings=[2,2],
    #                     bias=True, norm_type=None)
    cfg = dict(
        inputs=1,
        fmaps=[8, 16], kwidth=[8, 8], poolings=[2, 2],
        dec_fmaps=[8, 1], dec_kwidth=[8, 8], dec_poolings=[2, 2],
    )
    B, C_in, T = 2, 1, 64

    key = jax.random.PRNGKey(0)
    kx, kp = jax.random.split(key)
    x = jax.random.normal(kx, (B, C_in, T), jnp.float32)
    params = init_params(kp, cfg["inputs"], cfg["fmaps"], cfg["kwidth"],
                         cfg["dec_fmaps"], cfg["dec_kwidth"])

    out = ae_se_forward(x, params, cfg)
    out = jax.block_until_ready(out)

    # shape check: encoder halves T twice, decoder doubles it back; Tanh output
    assert out.shape == (B, 1, T), out.shape
    assert bool(jnp.all(jnp.abs(out) <= 1.0)), "tanh output must be in [-1, 1]"
    print("KERNEL_OK")
</pallas_src>

<mosaic_0001>
module attributes {stable_mosaic.version = 11 : i64} {
  func.func @_ae_se_kernel(%arg0: i32, %arg1: memref<1x64x1xf32, #tpu.memory_space<vmem>>, %arg2: memref<8x1x8xf32, #tpu.memory_space<vmem>>, %arg3: memref<1x8xf32, #tpu.memory_space<vmem>>, %arg4: memref<1x8xf32, #tpu.memory_space<vmem>>, %arg5: memref<8x8x16xf32, #tpu.memory_space<vmem>>, %arg6: memref<1x16xf32, #tpu.memory_space<vmem>>, %arg7: memref<1x16xf32, #tpu.memory_space<vmem>>, %arg8: memref<8x16x8xf32, #tpu.memory_space<vmem>>, %arg9: memref<1x8xf32, #tpu.memory_space<vmem>>, %arg10: memref<1x8xf32, #tpu.memory_space<vmem>>, %arg11: memref<8x8x1xf32, #tpu.memory_space<vmem>>, %arg12: memref<1x1xf32, #tpu.memory_space<vmem>>, %arg13: memref<1x1xf32, #tpu.memory_space<vmem>>, %arg14: memref<1x64x1xf32, #tpu.memory_space<vmem>>, %arg15: memref<72x16xf32, #tpu.memory_space<vmem>>, %arg16: memref<72x16xf32, #tpu.memory_space<vmem>>) attributes {dimension_semantics = [#tpu.dimension_semantics<parallel>], iteration_bounds = array<i64: 2>, scalar_prefetch = 0 : i64, scratch_operands = 2 : i64, tpu.core_type = #tpu.core_type<tc>, window_params = [{transform_indices = @transform_0, window_bounds = array<i64: 1, 64, 1>}, {pipeline_mode = #tpu.pipeline_mode<synchronous>, transform_indices = @transform_1, window_bounds = array<i64: 8, 1, 8>}, {pipeline_mode = #tpu.pipeline_mode<synchronous>, transform_indices = @transform_2, window_bounds = array<i64: 1, 8>}, {pipeline_mode = #tpu.pipeline_mode<synchronous>, transform_indices = @transform_3, window_bounds = array<i64: 1, 8>}, {pipeline_mode = #tpu.pipeline_mode<synchronous>, transform_indices = @transform_4, window_bounds = array<i64: 8, 8, 16>}, {pipeline_mode = #tpu.pipeline_mode<synchronous>, transform_indices = @transform_5, window_bounds = array<i64: 1, 16>}, {pipeline_mode = #tpu.pipeline_mode<synchronous>, transform_indices = @transform_6, window_bounds = array<i64: 1, 16>}, {pipeline_mode = #tpu.pipeline_mode<synchronous>, transform_indices = @transform_7, window_bounds = array<i64: 8, 16, 8>}, {pipeline_mode = #tpu.pipeline_mode<synchronous>, transform_indices = @transform_8, window_bounds = array<i64: 1, 8>}, {pipeline_mode = #tpu.pipeline_mode<synchronous>, transform_indices = @transform_9, window_bounds = array<i64: 1, 8>}, {pipeline_mode = #tpu.pipeline_mode<synchronous>, transform_indices = @transform_10, window_bounds = array<i64: 8, 8, 1>}, {pipeline_mode = #tpu.pipeline_mode<synchronous>, transform_indices = @transform_11, window_bounds = array<i64: 1, 1>}, {pipeline_mode = #tpu.pipeline_mode<synchronous>, transform_indices = @transform_12, window_bounds = array<i64: 1, 1>}, {transform_indices = @transform_13, window_bounds = array<i64: 1, 64, 1>}]} {
    %c0 = arith.constant 0 : index
    %c0_0 = arith.constant 0 : index
    %c0_1 = arith.constant 0 : index
    %0 = vector.load %arg1[%c0, %c0_0, %c0_1] : memref<1x64x1xf32, #tpu.memory_space<vmem>>, vector<1x64x1xf32>
    %1 = vector.shape_cast %0 : vector<1x64x1xf32> to vector<64x1xf32>
    %c0_2 = arith.constant 0 : index
    %c0_3 = arith.constant 0 : index
    %2 = vector.load %arg3[%c0_2, %c0_3] : memref<1x8xf32, #tpu.memory_space<vmem>>, vector<1x8xf32>
    %c0_4 = arith.constant 0 : index
    %c0_5 = arith.constant 0 : index
    %3 = vector.load %arg4[%c0_4, %c0_5] : memref<1x8xf32, #tpu.memory_space<vmem>>, vector<1x8xf32>
    %c3 = arith.constant 3 : index
    %c0_6 = arith.constant 0 : index
    %4 = vector.load %arg15[%c3, %c0_6] : memref<72x16xf32, #tpu.memory_space<vmem>>, vector<64x1xf32>
    tpu.vector_store %arg15[%c3, %c0_6], %1 {strides = array<i32>} : memref<72x16xf32, #tpu.memory_space<vmem>>, vector<64x1xf32>,
    %5 = vector.extract_strided_slice %1 {offsets = [3, 0], sizes = [1, 1], strides = [1, 1]} : vector<64x1xf32> to vector<1x1xf32>
    %c0_7 = arith.constant 0 : index
    %c0_8 = arith.constant 0 : index
    %6 = vector.load %arg15[%c0_7, %c0_8] : memref<72x16xf32, #tpu.memory_space<vmem>>, vector<1x1xf32>
    tpu.vector_store %arg15[%c0_7, %c0_8], %5 {strides = array<i32>} : memref<72x16xf32, #tpu.memory_space<vmem>>, vector<1x1xf32>,
    %7 = vector.extract_strided_slice %1 {offsets = [2, 0], sizes = [1, 1], strides = [1, 1]} : vector<64x1xf32> to vector<1x1xf32>
    %c1 = arith.constant 1 : index
    %c0_9 = arith.constant 0 : index
    %8 = vector.load %arg15[%c1, %c0_9] : memref<72x16xf32, #tpu.memory_space<vmem>>, vector<1x1xf32>
    tpu.vector_store %arg15[%c1, %c0_9], %7 {strides = array<i32>} : memref<72x16xf32, #tpu.memory_space<vmem>>, vector<1x1xf32>,
    %9 = vector.extract_strided_slice %1 {offsets = [1, 0], sizes = [1, 1], strides = [1, 1]} : vector<64x1xf32> to vector<1x1xf32>
    %c2 = arith.constant 2 : index
    %c0_10 = arith.constant 0 : index
    %10 = vector.load %arg15[%c2, %c0_10] : memref<72x16xf32, #tpu.memory_space<vmem>>, vector<1x1xf32>
    tpu.vector_store %arg15[%c2, %c0_10], %9 {strides = array<i32>} : memref<72x16xf32, #tpu.memory_space<vmem>>, vector<1x1xf32>,
    %11 = vector.extract_strided_slice %1 {offsets = [62, 0], sizes = [1, 1], strides = [1, 1]} : vector<64x1xf32> to vector<1x1xf32>
    %c67 = arith.constant 67 : index
    %c0_11 = arith.constant 0 : index
    %12 = vector.load %arg15[%c67, %c0_11] : memref<72x16xf32, #tpu.memory_space<vmem>>, vector<1x1xf32>
    tpu.vector_store %arg15[%c67, %c0_11], %11 {strides = array<i32>} : memref<72x16xf32, #tpu.memory_space<vmem>>, vector<1x1xf32>,
    %13 = vector.extract_strided_slice %1 {offsets = [61, 0], sizes = [1, 1], strides = [1, 1]} : vector<64x1xf32> to vector<1x1xf32>
    %c68 = arith.constant 68 : index
    %c0_12 = arith.constant 0 : index
    %14 = vector.load %arg15[%c68, %c0_12] : memref<72x16xf32, #tpu.memory_space<vmem>>, vector<1x1xf32>
    tpu.vector_store %arg15[%c68, %c0_12], %13 {strides = array<i32>} : memref<72x16xf32, #tpu.memory_space<vmem>>, vector<1x1xf32>,
    %15 = vector.extract_strided_slice %1 {offsets = [60, 0], sizes = [1, 1], strides = [1, 1]} : vector<64x1xf32> to vector<1x1xf32>
    %c69 = arith.constant 69 : index
    %c0_13 = arith.constant 0 : index
    %16 = vector.load %arg15[%c69, %c0_13] : memref<72x16xf32, #tpu.memory_space<vmem>>, vector<1x1xf32>
    tpu.vector_store %arg15[%c69, %c0_13], %15 {strides = array<i32>} : memref<72x16xf32, #tpu.memory_space<vmem>>, vector<1x1xf32>,
    %17 = vector.extract_strided_slice %1 {offsets = [59, 0], sizes = [1, 1], strides = [1, 1]} : vector<64x1xf32> to vector<1x1xf32>
    %c70 = arith.constant 70 : index
    %c0_14 = arith.constant 0 : index
    %18 = vector.load %arg15[%c70, %c0_14] : memref<72x16xf32, #tpu.memory_space<vmem>>, vector<1x1xf32>
    tpu.vector_store %arg15[%c70, %c0_14], %17 {strides = array<i32>} : memref<72x16xf32, #tpu.memory_space<vmem>>, vector<1x1xf32>,
    %cst = arith.constant 0.000000e+00 : f32
    %19 = vector.broadcast %cst : f32 to vector<32x8xf32>
    %20 = vector.broadcast %2 : vector<1x8xf32> to vector<32x8xf32>
    %21 = arith.addf %19, %20 : vector<32x8xf32>
    %c0_15 = arith.constant 0 : index
    %c0_16 = arith.constant 0 : index
    %22 = tpu.strided_load %arg15[%c0_15, %c0_16] {strides = array<i32: 2, 1>} : memref<72x16xf32, #tpu.memory_space<vmem>>, vector<32x1xf32>
    %c0_17 = arith.constant 0 : index
    %c0_18 = arith.constant 0 : index
    %c0_19 = arith.constant 0 : index
    %23 = vector.load %arg2[%c0_17, %c0_18, %c0_19] : memref<8x1x8xf32, #tpu.memory_space<vmem>>, vector<1x1x8xf32>
    %24 = vector.shape_cast %23 : vector<1x1x8xf32> to vector<1x8xf32>
    %25 = vector.broadcast %22 : vector<32x1xf32> to vector<32x8xf32>
    %26 = vector.broadcast %24 : vector<1x8xf32> to vector<32x8xf32>
    %27 = arith.mulf %25, %26 : vector<32x8xf32>
    %28 = arith.addf %21, %27 : vector<32x8xf32>
    %c1_20 = arith.constant 1 : index
    %c0_21 = arith.constant 0 : index
    %29 = tpu.strided_load %arg15[%c1_20, %c0_21] {strides = array<i32: 2, 1>} : memref<72x16xf32, #tpu.memory_space<vmem>>, vector<32x1xf32>
    %c1_22 = arith.constant 1 : index
    %c0_23 = arith.constant 0 : index
    %c0_24 = arith.constant 0 : index
    %30 = vector.load %arg2[%c1_22, %c0_23, %c0_24] : memref<8x1x8xf32, #tpu.memory_space<vmem>>, vector<1x1x8xf32>
    %31 = vector.shape_cast %30 : vector<1x1x8xf32> to vector<1x8xf32>
    %32 = vector.broadcast %29 : vector<32x1xf32> to vector<32x8xf32>
    %33 = vector.broadcast %31 : vector<1x8xf32> to vector<32x8xf32>
    %34 = arith.mulf %32, %33 : vector<32x8xf32>
    %35 = arith.addf %28, %34 : vector<32x8xf32>
    %c2_25 = arith.constant 2 : index
    %c0_26 = arith.constant 0 : index
    %36 = tpu.strided_load %arg15[%c2_25, %c0_26] {strides = array<i32: 2, 1>} : memref<72x16xf32, #tpu.memory_space<vmem>>, vector<32x1xf32>
    %c2_27 = arith.constant 2 : index
    %c0_28 = arith.constant 0 : index
    %c0_29 = arith.constant 0 : index
    %37 = vector.load %arg2[%c2_27, %c0_28, %c0_29] : memref<8x1x8xf32, #tpu.memory_space<vmem>>, vector<1x1x8xf32>
    %38 = vector.shape_cast %37 : vector<1x1x8xf32> to vector<1x8xf32>
    %39 = vector.broadcast %36 : vector<32x1xf32> to vector<32x8xf32>
    %40 = vector.broadcast %38 : vector<1x8xf32> to vector<32x8xf32>
    %41 = arith.mulf %39, %40 : vector<32x8xf32>
    %42 = arith.addf %35, %41 : vector<32x8xf32>
    %c3_30 = arith.constant 3 : index
    %c0_31 = arith.constant 0 : index
    %43 = tpu.strided_load %arg15[%c3_30, %c0_31] {strides = array<i32: 2, 1>} : memref<72x16xf32, #tpu.memory_space<vmem>>, vector<32x1xf32>
    %c3_32 = arith.constant 3 : index
    %c0_33 = arith.constant 0 : index
    %c0_34 = arith.constant 0 : index
    %44 = vector.load %arg2[%c3_32, %c0_33, %c0_34] : memref<8x1x8xf32, #tpu.memory_space<vmem>>, vector<1x1x8xf32>
    %45 = vector.shape_cast %44 : vector<1x1x8xf32> to vector<1x8xf32>
    %46 = vector.broadcast %43 : vector<32x1xf32> to vector<32x8xf32>
    %47 = vector.broadcast %45 : vector<1x8xf32> to vector<32x8xf32>
    %48 = arith.mulf %46, %47 : vector<32x8xf32>
    %49 = arith.addf %42, %48 : vector<32x8xf32>
    %c4 = arith.constant 4 : index
    %c0_35 = arith.constant 0 : index
    %50 = tpu.strided_load %arg15[%c4, %c0_35] {strides = array<i32: 2, 1>} : memref<72x16xf32, #tpu.memory_space<vmem>>, vector<32x1xf32>
    %c4_36 = arith.constant 4 : index
    %c0_37 = arith.constant 0 : index
    %c0_38 = arith.constant 0 : index
    %51 = vector.load %arg2[%c4_36, %c0_37, %c0_38] : memref<8x1x8xf32, #tpu.memory_space<vmem>>, vector<1x1x8xf32>
    %52 = vector.shape_cast %51 : vector<1x1x8xf32> to vector<1x8xf32>
    %53 = vector.broadcast %50 : vector<32x1xf32> to vector<32x8xf32>
    %54 = vector.broadcast %52 : vector<1x8xf32> to vector<32x8xf32>
    %55 = arith.mulf %53, %54 : vector<32x8xf32>
    %56 = arith.addf %49, %55 : vector<32x8xf32>
    %c5 = arith.constant 5 : index
    %c0_39 = arith.constant 0 : index
    %57 = tpu.strided_load %arg15[%c5, %c0_39] {strides = array<i32: 2, 1>} : memref<72x16xf32, #tpu.memory_space<vmem>>, vector<32x1xf32>
    %c5_40 = arith.constant 5 : index
    %c0_41 = arith.constant 0 : index
    %c0_42 = arith.constant 0 : index
    %58 = vector.load %arg2[%c5_40, %c0_41, %c0_42] : memref<8x1x8xf32, #tpu.memory_space<vmem>>, vector<1x1x8xf32>
    %59 = vector.shape_cast %58 : vector<1x1x8xf32> to vector<1x8xf32>
    %60 = vector.broadcast %57 : vector<32x1xf32> to vector<32x8xf32>
    %61 = vector.broadcast %59 : vector<1x8xf32> to vector<32x8xf32>
    %62 = arith.mulf %60, %61 : vector<32x8xf32>
    %63 = arith.addf %56, %62 : vector<32x8xf32>
    %c6 = arith.constant 6 : index
    %c0_43 = arith.constant 0 : index
    %64 = tpu.strided_load %arg15[%c6, %c0_43] {strides = array<i32: 2, 1>} : memref<72x16xf32, #tpu.memory_space<vmem>>, vector<32x1xf32>
    %c6_44 = arith.constant 6 : index
    %c0_45 = arith.constant 0 : index
    %c0_46 = arith.constant 0 : index
    %65 = vector.load %arg2[%c6_44, %c0_45, %c0_46] : memref<8x1x8xf32, #tpu.memory_space<vmem>>, vector<1x1x8xf32>
    %66 = vector.shape_cast %65 : vector<1x1x8xf32> to vector<1x8xf32>
    %67 = vector.broadcast %64 : vector<32x1xf32> to vector<32x8xf32>
    %68 = vector.broadcast %66 : vector<1x8xf32> to vector<32x8xf32>
    %69 = arith.mulf %67, %68 : vector<32x8xf32>
    %70 = arith.addf %63, %69 : vector<32x8xf32>
    %c7 = arith.constant 7 : index
    %c0_47 = arith.constant 0 : index
    %71 = tpu.strided_load %arg15[%c7, %c0_47] {strides = array<i32: 2, 1>} : memref<72x16xf32, #tpu.memory_space<vmem>>, vector<32x1xf32>
    %c7_48 = arith.constant 7 : index
    %c0_49 = arith.constant 0 : index
    %c0_50 = arith.constant 0 : index
    %72 = vector.load %arg2[%c7_48, %c0_49, %c0_50] : memref<8x1x8xf32, #tpu.memory_space<vmem>>, vector<1x1x8xf32>
    %73 = vector.shape_cast %72 : vector<1x1x8xf32> to vector<1x8xf32>
    %74 = vector.broadcast %71 : vector<32x1xf32> to vector<32x8xf32>
    %75 = vector.broadcast %73 : vector<1x8xf32> to vector<32x8xf32>
    %76 = arith.mulf %74, %75 : vector<32x8xf32>
    %77 = arith.addf %70, %76 : vector<32x8xf32>
    %cst_51 = arith.constant 0.000000e+00 : f32
    %78 = vector.broadcast %cst_51 : f32 to vector<32x8xf32>
    %79 = arith.cmpf oge, %77, %78 : vector<32x8xf32>
    %80 = vector.broadcast %3 : vector<1x8xf32> to vector<32x8xf32>
    %81 = arith.mulf %80, %77 : vector<32x8xf32>
    %82 = arith.select %79, %77, %81 : vector<32x8xi1>, vector<32x8xf32>
    %c0_52 = arith.constant 0 : index
    %c0_53 = arith.constant 0 : index
    %83 = vector.load %arg6[%c0_52, %c0_53] : memref<1x16xf32, #tpu.memory_space<vmem>>, vector<1x16xf32>
    %c0_54 = arith.constant 0 : index
    %c0_55 = arith.constant 0 : index
    %84 = vector.load %arg7[%c0_54, %c0_55] : memref<1x16xf32, #tpu.memory_space<vmem>>, vector<1x16xf32>
    %c3_56 = arith.constant 3 : index
    %c0_57 = arith.constant 0 : index
    %85 = vector.load %arg15[%c3_56, %c0_57] : memref<72x16xf32, #tpu.memory_space<vmem>>, vector<32x8xf32>
    tpu.vector_store %arg15[%c3_56, %c0_57], %82 {strides = array<i32>} : memref<72x16xf32, #tpu.memory_space<vmem>>, vector<32x8xf32>,
    %86 = vector.extract_strided_slice %82 {offsets = [3, 0], sizes = [1, 8], strides = [1, 1]} : vector<32x8xf32> to vector<1x8xf32>
    %c0_58 = arith.constant 0 : index
    %c0_59 = arith.constant 0 : index
    %87 = vector.load %arg15[%c0_58, %c0_59] : memref<72x16xf32, #tpu.memory_space<vmem>>, vector<1x8xf32>
    tpu.vector_store %arg15[%c0_58, %c0_59], %86 {strides = array<i32>} : memref<72x16xf32, #tpu.memory_space<vmem>>, vector<1x8xf32>,
    %88 = vector.extract_strided_slice %82 {offsets = [2, 0], sizes = [1, 8], strides = [1, 1]} : vector<32x8xf32> to vector<1x8xf32>
    %c1_60 = arith.constant 1 : index
    %c0_61 = arith.constant 0 : index
    %89 = vector.load %arg15[%c1_60, %c0_61] : memref<72x16xf32, #tpu.memory_space<vmem>>, vector<1x8xf32>
    tpu.vector_store %arg15[%c1_60, %c0_61], %88 {strides = array<i32>} : memref<72x16xf32, #tpu.memory_space<vmem>>, vector<1x8xf32>,
    %90 = vector.extract_strided_slice %82 {offsets = [1, 0], sizes = [1, 8], strides = [1, 1]} : vector<32x8xf32> to vector<1x8xf32>
    %c2_62 = arith.constant 2 : index
    %c0_63 = arith.constant 0 : index
    %91 = vector.load %arg15[%c2_62, %c0_63] : memref<72x16xf32, #tpu.memory_space<vmem>>, vector<1x8xf32>
    tpu.vector_store %arg15[%c2_62, %c0_63], %90 {strides = array<i32>} : memref<72x16xf32, #tpu.memory_space<vmem>>, vector<1x8xf32>,
    %92 = vector.extract_strided_slice %82 {offsets = [30, 0], sizes = [1, 8], strides = [1, 1]} : vector<32x8xf32> to vector<1x8xf32>
    %c35 = arith.constant 35 : index
    %c0_64 = arith.constant 0 : index
    %93 = vector.load %arg15[%c35, %c0_64] : memref<72x16xf32, #tpu.memory_space<vmem>>, vector<1x8xf32>
    tpu.vector_store %arg15[%c35, %c0_64], %92 {strides = array<i32>} : memref<72x16xf32, #tpu.memory_space<vmem>>, vector<1x8xf32>,
    %94 = vector.extract_strided_slice %82 {offsets = [29, 0], sizes = [1, 8], strides = [1, 1]} : vector<32x8xf32> to vector<1x8xf32>
    %c36 = arith.constant 36 : index
    %c0_65 = arith.constant 0 : index
    %95 = vector.load %arg15[%c36, %c0_65] : memref<72x16xf32, #tpu.memory_space<vmem>>, vector<1x8xf32>
    tpu.vector_store %arg15[%c36, %c0_65], %94 {strides = array<i32>} : memref<72x16xf32, #tpu.memory_space<vmem>>, vector<1x8xf32>,
    %96 = vector.extract_strided_slice %82 {offsets = [28, 0], sizes = [1, 8], strides = [1, 1]} : vector<32x8xf32> to vector<1x8xf32>
    %c37 = arith.constant 37 : index
    %c0_66 = arith.constant 0 : index
    %97 = vector.load %arg15[%c37, %c0_66] : memref<72x16xf32, #tpu.memory_space<vmem>>, vector<1x8xf32>
    tpu.vector_store %arg15[%c37, %c0_66], %96 {strides = array<i32>} : memref<72x16xf32, #tpu.memory_space<vmem>>, vector<1x8xf32>,
    %98 = vector.extract_strided_slice %82 {offsets = [27, 0], sizes = [1, 8], strides = [1, 1]} : vector<32x8xf32> to vector<1x8xf32>
    %c38 = arith.constant 38 : index
    %c0_67 = arith.constant 0 : index
    %99 = vector.load %arg15[%c38, %c0_67] : memref<72x16xf32, #tpu.memory_space<vmem>>, vector<1x8xf32>
    tpu.vector_store %arg15[%c38, %c0_67], %98 {strides = array<i32>} : memref<72x16xf32, #tpu.memory_space<vmem>>, vector<1x8xf32>,
    %cst_68 = arith.constant 0.000000e+00 : f32
    %100 = vector.broadcast %cst_68 : f32 to vector<16x16xf32>
    %101 = vector.broadcast %83 : vector<1x16xf32> to vector<16x16xf32>
    %102 = arith.addf %100, %101 : vector<16x16xf32>
    %c0_69 = arith.constant 0 : index
    %c0_70 = arith.constant 0 : index
    %103 = tpu.strided_load %arg15[%c0_69, %c0_70] {strides = array<i32: 2, 1>} : memref<72x16xf32, #tpu.memory_space<vmem>>, vector<16x8xf32>
    %c0_71 = arith.constant 0 : index
    %c0_72 = arith.constant 0 : index
    %c0_73 = arith.constant 0 : index
    %104 = vector.load %arg5[%c0_71, %c0_72, %c0_73] : memref<8x8x16xf32, #tpu.memory_space<vmem>>, vector<1x8x16xf32>
    %105 = vector.shape_cast %104 : vector<1x8x16xf32> to vector<8x16xf32>
    %cst_74 = arith.constant dense<0.000000e+00> : vector<16x16xf32>
    %106 = tpu.matmul %103, %105, %cst_74 {dimension_numbers = #tpu.dot_dimension_numbers<[1], [0], [0], [1], [0, 0, 1, 1], [], []>} : vector<16x8xf32>, vector<8x16xf32>, vector<16x16xf32> -> vector<16x16xf32>
    %107 = arith.addf %102, %106 : vector<16x16xf32>
    %c1_75 = arith.constant 1 : index
    %c0_76 = arith.constant 0 : index
    %108 = tpu.strided_load %arg15[%c1_75, %c0_76] {strides = array<i32: 2, 1>} : memref<72x16xf32, #tpu.memory_space<vmem>>, vector<16x8xf32>
    %c1_77 = arith.constant 1 : index
    %c0_78 = arith.constant 0 : index
    %c0_79 = arith.constant 0 : index
    %109 = vector.load %arg5[%c1_77, %c0_78, %c0_79] : memref<8x8x16xf32, #tpu.memory_space<vmem>>, vector<1x8x16xf32>
    %110 = vector.shape_cast %109 : vector<1x8x16xf32> to vector<8x16xf32>
    %cst_80 = arith.constant dense<0.000000e+00> : vector<16x16xf32>
    %111 = tpu.matmul %108, %110, %cst_80 {dimension_numbers = #tpu.dot_dimension_numbers<[1], [0], [0], [1], [0, 0, 1, 1], [], []>} : vector<16x8xf32>, vector<8x16xf32>, vector<16x16xf32> -> vector<16x16xf32>
    %112 = arith.addf %107, %111 : vector<16x16xf32>
    %c2_81 = arith.constant 2 : index
    %c0_82 = arith.constant 0 : index
    %113 = tpu.strided_load %arg15[%c2_81, %c0_82] {strides = array<i32: 2, 1>} : memref<72x16xf32, #tpu.memory_space<vmem>>, vector<16x8xf32>
    %c2_83 = arith.constant 2 : index
    %c0_84 = arith.constant 0 : index
    %c0_85 = arith.constant 0 : index
    %114 = vector.load %arg5[%c2_83, %c0_84, %c0_85] : memref<8x8x16xf32, #tpu.memory_space<vmem>>, vector<1x8x16xf32>
    %115 = vector.shape_cast %114 : vector<1x8x16xf32> to vector<8x16xf32>
    %cst_86 = arith.constant dense<0.000000e+00> : vector<16x16xf32>
    %116 = tpu.matmul %113, %115, %cst_86 {dimension_numbers = #tpu.dot_dimension_numbers<[1], [0], [0], [1], [0, 0, 1, 1], [], []>} : vector<16x8xf32>, vector<8x16xf32>, vector<16x16xf32> -> vector<16x16xf32>
    %117 = arith.addf %112, %116 : vector<16x16xf32>
    %c3_87 = arith.constant 3 : index
    %c0_88 = arith.constant 0 : index
    %118 = tpu.strided_load %arg15[%c3_87, %c0_88] {strides = array<i32: 2, 1>} : memref<72x16xf32, #tpu.memory_space<vmem>>, vector<16x8xf32>
    %c3_89 = arith.constant 3 : index
    %c0_90 = arith.constant 0 : index
    %c0_91 = arith.constant 0 : index
    %119 = vector.load %arg5[%c3_89, %c0_90, %c0_91] : memref<8x8x16xf32, #tpu.memory_space<vmem>>, vector<1x8x16xf32>
    %120 = vector.shape_cast %119 : vector<1x8x16xf32> to vector<8x16xf32>
    %cst_92 = arith.constant dense<0.000000e+00> : vector<16x16xf32>
    %121 = tpu.matmul %118, %120, %cst_92 {dimension_numbers = #tpu.dot_dimension_numbers<[1], [0], [0], [1], [0, 0, 1, 1], [], []>} : vector<16x8xf32>, vector<8x16xf32>, vector<16x16xf32> -> vector<16x16xf32>
    %122 = arith.addf %117, %121 : vector<16x16xf32>
    %c4_93 = arith.constant 4 : index
    %c0_94 = arith.constant 0 : index
    %123 = tpu.strided_load %arg15[%c4_93, %c0_94] {strides = array<i32: 2, 1>} : memref<72x16xf32, #tpu.memory_space<vmem>>, vector<16x8xf32>
    %c4_95 = arith.constant 4 : index
    %c0_96 = arith.constant 0 : index
    %c0_97 = arith.constant 0 : index
    %124 = vector.load %arg5[%c4_95, %c0_96, %c0_97] : memref<8x8x16xf32, #tpu.memory_space<vmem>>, vector<1x8x16xf32>
    %125 = vector.shape_cast %124 : vector<1x8x16xf32> to vector<8x16xf32>
    %cst_98 = arith.constant dense<0.000000e+00> : vector<16x16xf32>
    %126 = tpu.matmul %123, %125, %cst_98 {dimension_numbers = #tpu.dot_dimension_numbers<[1], [0], [0], [1], [0, 0, 1, 1], [], []>} : vector<16x8xf32>, vector<8x16xf32>, vector<16x16xf32> -> vector<16x16xf32>
    %127 = arith.addf %122, %126 : vector<16x16xf32>
    %c5_99 = arith.constant 5 : index
    %c0_100 = arith.constant 0 : index
    %128 = tpu.strided_load %arg15[%c5_99, %c0_100] {strides = array<i32: 2, 1>} : memref<72x16xf32, #tpu.memory_space<vmem>>, vector<16x8xf32>
    %c5_101 = arith.constant 5 : index
    %c0_102 = arith.constant 0 : index
    %c0_103 = arith.constant 0 : index
    %129 = vector.load %arg5[%c5_101, %c0_102, %c0_103] : memref<8x8x16xf32, #tpu.memory_space<vmem>>, vector<1x8x16xf32>
    %130 = vector.shape_cast %129 : vector<1x8x16xf32> to vector<8x16xf32>
    %cst_104 = arith.constant dense<0.000000e+00> : vector<16x16xf32>
    %131 = tpu.matmul %128, %130, %cst_104 {dimension_numbers = #tpu.dot_dimension_numbers<[1], [0], [0], [1], [0, 0, 1, 1], [], []>} : vector<16x8xf32>, vector<8x16xf32>, vector<16x16xf32> -> vector<16x16xf32>
    %132 = arith.addf %127, %131 : vector<16x16xf32>
    %c6_105 = arith.constant 6 : index
    %c0_106 = arith.constant 0 : index
    %133 = tpu.strided_load %arg15[%c6_105, %c0_106] {strides = array<i32: 2, 1>} : memref<72x16xf32, #tpu.memory_space<vmem>>, vector<16x8xf32>
    %c6_107 = arith.constant 6 : index
    %c0_108 = arith.constant 0 : index
    %c0_109 = arith.constant 0 : index
    %134 = vector.load %arg5[%c6_107, %c0_108, %c0_109] : memref<8x8x16xf32, #tpu.memory_space<vmem>>, vector<1x8x16xf32>
    %135 = vector.shape_cast %134 : vector<1x8x16xf32> to vector<8x16xf32>
    %cst_110 = arith.constant dense<0.000000e+00> : vector<16x16xf32>
    %136 = tpu.matmul %133, %135, %cst_110 {dimension_numbers = #tpu.dot_dimension_numbers<[1], [0], [0], [1], [0, 0, 1, 1], [], []>} : vector<16x8xf32>, vector<8x16xf32>, vector<16x16xf32> -> vector<16x16xf32>
    %137 = arith.addf %132, %136 : vector<16x16xf32>
    %c7_111 = arith.constant 7 : index
    %c0_112 = arith.constant 0 : index
    %138 = tpu.strided_load %arg15[%c7_111, %c0_112] {strides = array<i32: 2, 1>} : memref<72x16xf32, #tpu.memory_space<vmem>>, vector<16x8xf32>
    %c7_113 = arith.constant 7 : index
    %c0_114 = arith.constant 0 : index
    %c0_115 = arith.constant 0 : index
    %139 = vector.load %arg5[%c7_113, %c0_114, %c0_115] : memref<8x8x16xf32, #tpu.memory_space<vmem>>, vector<1x8x16xf32>
    %140 = vector.shape_cast %139 : vector<1x8x16xf32> to vector<8x16xf32>
    %cst_116 = arith.constant dense<0.000000e+00> : vector<16x16xf32>
    %141 = tpu.matmul %138, %140, %cst_116 {dimension_numbers = #tpu.dot_dimension_numbers<[1], [0], [0], [1], [0, 0, 1, 1], [], []>} : vector<16x8xf32>, vector<8x16xf32>, vector<16x16xf32> -> vector<16x16xf32>
    %142 = arith.addf %137, %141 : vector<16x16xf32>
    %cst_117 = arith.constant 0.000000e+00 : f32
    %143 = vector.broadcast %cst_117 : f32 to vector<16x16xf32>
    %144 = arith.cmpf oge, %142, %143 : vector<16x16xf32>
    %145 = vector.broadcast %84 : vector<1x16xf32> to vector<16x16xf32>
    %146 = arith.mulf %145, %142 : vector<16x16xf32>
    %147 = arith.select %144, %142, %146 : vector<16x16xi1>, vector<16x16xf32>
    %c0_118 = arith.constant 0 : index
    %c0_119 = arith.constant 0 : index
    %148 = vector.load %arg9[%c0_118, %c0_119] : memref<1x8xf32, #tpu.memory_space<vmem>>, vector<1x8xf32>
    %c0_120 = arith.constant 0 : index
    %c0_121 = arith.constant 0 : index
    %149 = vector.load %arg10[%c0_120, %c0_121] : memref<1x8xf32, #tpu.memory_space<vmem>>, vector<1x8xf32>
    %cst_122 = arith.constant 0.000000e+00 : f32
    %150 = vector.broadcast %cst_122 : f32 to vector<4x16xf32>
    %c0_123 = arith.constant 0 : index
    %c0_124 = arith.constant 0 : index
    %151 = vector.load %arg15[%c0_123, %c0_124] : memref<72x16xf32, #tpu.memory_space<vmem>>, vector<4x16xf32>
    tpu.vector_store %arg15[%c0_123, %c0_124], %150 {strides = array<i32>} : memref<72x16xf32, #tpu.memory_space<vmem>>, vector<4x16xf32>,
    %c4_125 = arith.constant 4 : index
    %c0_126 = arith.constant 0 : index
    %152 = vector.load %arg15[%c4_125, %c0_126] : memref<72x16xf32, #tpu.memory_space<vmem>>, vector<16x16xf32>
    tpu.vector_store %arg15[%c4_125, %c0_126], %147 {strides = array<i32>} : memref<72x16xf32, #tpu.memory_space<vmem>>, vector<16x16xf32>,
    %c20 = arith.constant 20 : index
    %c0_127 = arith.constant 0 : index
    %153 = vector.load %arg15[%c20, %c0_127] : memref<72x16xf32, #tpu.memory_space<vmem>>, vector<4x16xf32>
    tpu.vector_store %arg15[%c20, %c0_127], %150 {strides = array<i32>} : memref<72x16xf32, #tpu.memory_space<vmem>>, vector<4x16xf32>,
    %cst_128 = arith.constant 0.000000e+00 : f32
    %154 = vector.broadcast %cst_128 : f32 to vector<16x8xf32>
    %155 = vector.broadcast %148 : vector<1x8xf32> to vector<16x8xf32>
    %156 = arith.addf %154, %155 : vector<16x8xf32>
    %c6_129 = arith.constant 6 : index
    %c0_130 = arith.constant 0 : index
    %157 = vector.load %arg15[%c6_129, %c0_130] : memref<72x16xf32, #tpu.memory_space<vmem>>, vector<16x16xf32>
    %c0_131 = arith.constant 0 : index
    %c0_132 = arith.constant 0 : index
    %c0_133 = arith.constant 0 : index
    %158 = vector.load %arg8[%c0_131, %c0_132, %c0_133] : memref<8x16x8xf32, #tpu.memory_space<vmem>>, vector<1x16x8xf32>
    %159 = vector.shape_cast %158 : vector<1x16x8xf32> to vector<16x8xf32>
    %cst_134 = arith.constant dense<0.000000e+00> : vector<16x8xf32>
    %160 = tpu.matmul %157, %159, %cst_134 {dimension_numbers = #tpu.dot_dimension_numbers<[1], [0], [0], [1], [0, 0, 1, 1], [], []>} : vector<16x16xf32>, vector<16x8xf32>, vector<16x8xf32> -> vector<16x8xf32>
    %161 = arith.addf %156, %160 : vector<16x8xf32>
    %c5_135 = arith.constant 5 : index
    %c0_136 = arith.constant 0 : index
    %162 = vector.load %arg15[%c5_135, %c0_136] : memref<72x16xf32, #tpu.memory_space<vmem>>, vector<16x16xf32>
    %c2_137 = arith.constant 2 : index
    %c0_138 = arith.constant 0 : index
    %c0_139 = arith.constant 0 : index
    %163 = vector.load %arg8[%c2_137, %c0_138, %c0_139] : memref<8x16x8xf32, #tpu.memory_space<vmem>>, vector<1x16x8xf32>
    %164 = vector.shape_cast %163 : vector<1x16x8xf32> to vector<16x8xf32>
    %cst_140 = arith.constant dense<0.000000e+00> : vector<16x8xf32>
    %165 = tpu.matmul %162, %164, %cst_140 {dimension_numbers = #tpu.dot_dimension_numbers<[1], [0], [0], [1], [0, 0, 1, 1], [], []>} : vector<16x16xf32>, vector<16x8xf32>, vector<16x8xf32> -> vector<16x8xf32>
    %166 = arith.addf %161, %165 : vector<16x8xf32>
    %c4_141 = arith.constant 4 : index
    %c0_142 = arith.constant 0 : index
    %167 = vector.load %arg15[%c4_141, %c0_142] : memref<72x16xf32, #tpu.memory_space<vmem>>, vector<16x16xf32>
    %c4_143 = arith.constant 4 : index
    %c0_144 = arith.constant 0 : index
    %c0_145 = arith.constant 0 : index
    %168 = vector.load %arg8[%c4_143, %c0_144, %c0_145] : memref<8x16x8xf32, #tpu.memory_space<vmem>>, vector<1x16x8xf32>
    %169 = vector.shape_cast %168 : vector<1x16x8xf32> to vector<16x8xf32>
    %cst_146 = arith.constant dense<0.000000e+00> : vector<16x8xf32>
    %170 = tpu.matmul %167, %169, %cst_146 {dimension_numbers = #tpu.dot_dimension_numbers<[1], [0], [0], [1], [0, 0, 1, 1], [], []>} : vector<16x16xf32>, vector<16x8xf32>, vector<16x8xf32> -> vector<16x8xf32>
    %171 = arith.addf %166, %170 : vector<16x8xf32>
    %c3_147 = arith.constant 3 : index
    %c0_148 = arith.constant 0 : index
    %172 = vector.load %arg15[%c3_147, %c0_148] : memref<72x16xf32, #tpu.memory_space<vmem>>, vector<16x16xf32>
    %c6_149 = arith.constant 6 : index
    %c0_150 = arith.constant 0 : index
    %c0_151 = arith.constant 0 : index
    %173 = vector.load %arg8[%c6_149, %c0_150, %c0_151] : memref<8x16x8xf32, #tpu.memory_space<vmem>>, vector<1x16x8xf32>
    %174 = vector.shape_cast %173 : vector<1x16x8xf32> to vector<16x8xf32>
    %cst_152 = arith.constant dense<0.000000e+00> : vector<16x8xf32>
    %175 = tpu.matmul %172, %174, %cst_152 {dimension_numbers = #tpu.dot_dimension_numbers<[1], [0], [0], [1], [0, 0, 1, 1], [], []>} : vector<16x16xf32>, vector<16x8xf32>, vector<16x8xf32> -> vector<16x8xf32>
    %176 = arith.addf %171, %175 : vector<16x8xf32>
    %cst_153 = arith.constant 0.000000e+00 : f32
    %177 = vector.broadcast %cst_153 : f32 to vector<16x8xf32>
    %178 = arith.cmpf oge, %176, %177 : vector<16x8xf32>
    %179 = vector.broadcast %149 : vector<1x8xf32> to vector<16x8xf32>
    %180 = arith.mulf %179, %176 : vector<16x8xf32>
    %181 = arith.select %178, %176, %180 : vector<16x8xi1>, vector<16x8xf32>
    %c1_154 = arith.constant 1 : index
    %c0_155 = arith.constant 0 : index
    %182 = tpu.strided_load %arg16[%c1_154, %c0_155] {strides = array<i32: 2, 1>} : memref<72x16xf32, #tpu.memory_space<vmem>>, vector<16x8xf32>
    tpu.strided_store %arg16[%c1_154, %c0_155], %181 {strides = array<i32: 2, 1>} : memref<72x16xf32, #tpu.memory_space<vmem>>, vector<16x8xf32>
    %cst_156 = arith.constant 0.000000e+00 : f32
    %183 = vector.broadcast %cst_156 : f32 to vector<16x8xf32>
    %184 = vector.broadcast %148 : vector<1x8xf32> to vector<16x8xf32>
    %185 = arith.addf %183, %184 : vector<16x8xf32>
    %c5_157 = arith.constant 5 : index
    %c0_158 = arith.constant 0 : index
    %186 = vector.load %arg15[%c5_157, %c0_158] : memref<72x16xf32, #tpu.memory_space<vmem>>, vector<16x16xf32>
    %c1_159 = arith.constant 1 : index
    %c0_160 = arith.constant 0 : index
    %c0_161 = arith.constant 0 : index
    %187 = vector.load %arg8[%c1_159, %c0_160, %c0_161] : memref<8x16x8xf32, #tpu.memory_space<vmem>>, vector<1x16x8xf32>
    %188 = vector.shape_cast %187 : vector<1x16x8xf32> to vector<16x8xf32>
    %cst_162 = arith.constant dense<0.000000e+00> : vector<16x8xf32>
    %189 = tpu.matmul %186, %188, %cst_162 {dimension_numbers = #tpu.dot_dimension_numbers<[1], [0], [0], [1], [0, 0, 1, 1], [], []>} : vector<16x16xf32>, vector<16x8xf32>, vector<16x8xf32> -> vector<16x8xf32>
    %190 = arith.addf %185, %189 : vector<16x8xf32>
    %c4_163 = arith.constant 4 : index
    %c0_164 = arith.constant 0 : index
    %191 = vector.load %arg15[%c4_163, %c0_164] : memref<72x16xf32, #tpu.memory_space<vmem>>, vector<16x16xf32>
    %c3_165 = arith.constant 3 : index
    %c0_166 = arith.constant 0 : index
    %c0_167 = arith.constant 0 : index
    %192 = vector.load %arg8[%c3_165, %c0_166, %c0_167] : memref<8x16x8xf32, #tpu.memory_space<vmem>>, vector<1x16x8xf32>
    %193 = vector.shape_cast %192 : vector<1x16x8xf32> to vector<16x8xf32>
    %cst_168 = arith.constant dense<0.000000e+00> : vector<16x8xf32>
    %194 = tpu.matmul %191, %193, %cst_168 {dimension_numbers = #tpu.dot_dimension_numbers<[1], [0], [0], [1], [0, 0, 1, 1], [], []>} : vector<16x16xf32>, vector<16x8xf32>, vector<16x8xf32> -> vector<16x8xf32>
    %195 = arith.addf %190, %194 : vector<16x8xf32>
    %c3_169 = arith.constant 3 : index
    %c0_170 = arith.constant 0 : index
    %196 = vector.load %arg15[%c3_169, %c0_170] : memref<72x16xf32, #tpu.memory_space<vmem>>, vector<16x16xf32>
    %c5_171 = arith.constant 5 : index
    %c0_172 = arith.constant 0 : index
    %c0_173 = arith.constant 0 : index
    %197 = vector.load %arg8[%c5_171, %c0_172, %c0_173] : memref<8x16x8xf32, #tpu.memory_space<vmem>>, vector<1x16x8xf32>
    %198 = vector.shape_cast %197 : vector<1x16x8xf32> to vector<16x8xf32>
    %cst_174 = arith.constant dense<0.000000e+00> : vector<16x8xf32>
    %199 = tpu.matmul %196, %198, %cst_174 {dimension_numbers = #tpu.dot_dimension_numbers<[1], [0], [0], [1], [0, 0, 1, 1], [], []>} : vector<16x16xf32>, vector<16x8xf32>, vector<16x8xf32> -> vector<16x8xf32>
    %200 = arith.addf %195, %199 : vector<16x8xf32>
    %c2_175 = arith.constant 2 : index
    %c0_176 = arith.constant 0 : index
    %201 = vector.load %arg15[%c2_175, %c0_176] : memref<72x16xf32, #tpu.memory_space<vmem>>, vector<16x16xf32>
    %c7_177 = arith.constant 7 : index
    %c0_178 = arith.constant 0 : index
    %c0_179 = arith.constant 0 : index
    %202 = vector.load %arg8[%c7_177, %c0_178, %c0_179] : memref<8x16x8xf32, #tpu.memory_space<vmem>>, vector<1x16x8xf32>
    %203 = vector.shape_cast %202 : vector<1x16x8xf32> to vector<16x8xf32>
    %cst_180 = arith.constant dense<0.000000e+00> : vector<16x8xf32>
    %204 = tpu.matmul %201, %203, %cst_180 {dimension_numbers = #tpu.dot_dimension_numbers<[1], [0], [0], [1], [0, 0, 1, 1], [], []>} : vector<16x16xf32>, vector<16x8xf32>, vector<16x8xf32> -> vector<16x8xf32>
    %205 = arith.addf %200, %204 : vector<16x8xf32>
    %cst_181 = arith.constant 0.000000e+00 : f32
    %206 = vector.broadcast %cst_181 : f32 to vector<16x8xf32>
    %207 = arith.cmpf oge, %205, %206 : vector<16x8xf32>
    %208 = vector.broadcast %149 : vector<1x8xf32> to vector<16x8xf32>
    %209 = arith.mulf %208, %205 : vector<16x8xf32>
    %210 = arith.select %207, %205, %209 : vector<16x8xi1>, vector<16x8xf32>
    %c0_182 = arith.constant 0 : index
    %c0_183 = arith.constant 0 : index
    %211 = tpu.strided_load %arg16[%c0_182, %c0_183] {strides = array<i32: 2, 1>} : memref<72x16xf32, #tpu.memory_space<vmem>>, vector<16x8xf32>
    tpu.strided_store %arg16[%c0_182, %c0_183], %210 {strides = array<i32: 2, 1>} : memref<72x16xf32, #tpu.memory_space<vmem>>, vector<16x8xf32>
    %c0_184 = arith.constant 0 : index
    %c0_185 = arith.constant 0 : index
    %212 = vector.load %arg16[%c0_184, %c0_185] : memref<72x16xf32, #tpu.memory_space<vmem>>, vector<32x8xf32>
    %c0_186 = arith.constant 0 : index
    %c0_187 = arith.constant 0 : index
    %213 = vector.load %arg12[%c0_186, %c0_187] : memref<1x1xf32, #tpu.memory_space<vmem>>, vector<1x1xf32>
    %cst_188 = arith.constant 0.000000e+00 : f32
    %214 = vector.broadcast %cst_188 : f32 to vector<4x8xf32>
    %c0_189 = arith.constant 0 : index
    %c0_190 = arith.constant 0 : index
    %215 = vector.load %arg15[%c0_189, %c0_190] : memref<72x16xf32, #tpu.memory_space<vmem>>, vector<4x8xf32>
    tpu.vector_store %arg15[%c0_189, %c0_190], %214 {strides = array<i32>} : memref<72x16xf32, #tpu.memory_space<vmem>>, vector<4x8xf32>,
    %c4_191 = arith.constant 4 : index
    %c0_192 = arith.constant 0 : index
    %216 = vector.load %arg15[%c4_191, %c0_192] : memref<72x16xf32, #tpu.memory_space<vmem>>, vector<32x8xf32>
    tpu.vector_store %arg15[%c4_191, %c0_192], %212 {strides = array<i32>} : memref<72x16xf32, #tpu.memory_space<vmem>>, vector<32x8xf32>,
    %c36_193 = arith.constant 36 : index
    %c0_194 = arith.constant 0 : index
    %217 = vector.load %arg15[%c36_193, %c0_194] : memref<72x16xf32, #tpu.memory_space<vmem>>, vector<4x8xf32>
    tpu.vector_store %arg15[%c36_193, %c0_194], %214 {strides = array<i32>} : memref<72x16xf32, #tpu.memory_space<vmem>>, vector<4x8xf32>,
    %cst_195 = arith.constant 0.000000e+00 : f32
    %218 = vector.broadcast %cst_195 : f32 to vector<32x1xf32>
    %219 = vector.broadcast %213 : vector<1x1xf32> to vector<32x1xf32>
    %220 = arith.addf %218, %219 : vector<32x1xf32>
    %c6_196 = arith.constant 6 : index
    %c0_197 = arith.constant 0 : index
    %221 = vector.load %arg15[%c6_196, %c0_197] : memref<72x16xf32, #tpu.memory_space<vmem>>, vector<32x8xf32>
    %c0_198 = arith.constant 0 : index
    %c0_199 = arith.constant 0 : index
    %c0_200 = arith.constant 0 : index
    %222 = vector.load %arg11[%c0_198, %c0_199, %c0_200] : memref<8x8x1xf32, #tpu.memory_space<vmem>>, vector<1x8x1xf32>
    %223 = vector.shape_cast %222 : vector<1x8x1xf32> to vector<8x1xf32>
    %cst_201 = arith.constant dense<0.000000e+00> : vector<32x1xf32>
    %224 = tpu.matmul %221, %223, %cst_201 {dimension_numbers = #tpu.dot_dimension_numbers<[1], [0], [0], [1], [0, 0, 1, 1], [], []>} : vector<32x8xf32>, vector<8x1xf32>, vector<32x1xf32> -> vector<32x1xf32>
    %225 = arith.addf %220, %224 : vector<32x1xf32>
    %c5_202 = arith.constant 5 : index
    %c0_203 = arith.constant 0 : index
    %226 = vector.load %arg15[%c5_202, %c0_203] : memref<72x16xf32, #tpu.memory_space<vmem>>, vector<32x8xf32>
    %c2_204 = arith.constant 2 : index
    %c0_205 = arith.constant 0 : index
    %c0_206 = arith.constant 0 : index
    %227 = vector.load %arg11[%c2_204, %c0_205, %c0_206] : memref<8x8x1xf32, #tpu.memory_space<vmem>>, vector<1x8x1xf32>
    %228 = vector.shape_cast %227 : vector<1x8x1xf32> to vector<8x1xf32>
    %cst_207 = arith.constant dense<0.000000e+00> : vector<32x1xf32>
    %229 = tpu.matmul %226, %228, %cst_207 {dimension_numbers = #tpu.dot_dimension_numbers<[1], [0], [0], [1], [0, 0, 1, 1], [], []>} : vector<32x8xf32>, vector<8x1xf32>, vector<32x1xf32> -> vector<32x1xf32>
    %230 = arith.addf %225, %229 : vector<32x1xf32>
    %c4_208 = arith.constant 4 : index
    %c0_209 = arith.constant 0 : index
    %231 = vector.load %arg15[%c4_208, %c0_209] : memref<72x16xf32, #tpu.memory_space<vmem>>, vector<32x8xf32>
    %c4_210 = arith.constant 4 : index
    %c0_211 = arith.constant 0 : index
    %c0_212 = arith.constant 0 : index
    %232 = vector.load %arg11[%c4_210, %c0_211, %c0_212] : memref<8x8x1xf32, #tpu.memory_space<vmem>>, vector<1x8x1xf32>
    %233 = vector.shape_cast %232 : vector<1x8x1xf32> to vector<8x1xf32>
    %cst_213 = arith.constant dense<0.000000e+00> : vector<32x1xf32>
    %234 = tpu.matmul %231, %233, %cst_213 {dimension_numbers = #tpu.dot_dimension_numbers<[1], [0], [0], [1], [0, 0, 1, 1], [], []>} : vector<32x8xf32>, vector<8x1xf32>, vector<32x1xf32> -> vector<32x1xf32>
    %235 = arith.addf %230, %234 : vector<32x1xf32>
    %c3_214 = arith.constant 3 : index
    %c0_215 = arith.constant 0 : index
    %236 = vector.load %arg15[%c3_214, %c0_215] : memref<72x16xf32, #tpu.memory_space<vmem>>, vector<32x8xf32>
    %c6_216 = arith.constant 6 : index
    %c0_217 = arith.constant 0 : index
    %c0_218 = arith.constant 0 : index
    %237 = vector.load %arg11[%c6_216, %c0_217, %c0_218] : memref<8x8x1xf32, #tpu.memory_space<vmem>>, vector<1x8x1xf32>
    %238 = vector.shape_cast %237 : vector<1x8x1xf32> to vector<8x1xf32>
    %cst_219 = arith.constant dense<0.000000e+00> : vector<32x1xf32>
    %239 = tpu.matmul %236, %238, %cst_219 {dimension_numbers = #tpu.dot_dimension_numbers<[1], [0], [0], [1], [0, 0, 1, 1], [], []>} : vector<32x8xf32>, vector<8x1xf32>, vector<32x1xf32> -> vector<32x1xf32>
    %240 = arith.addf %235, %239 : vector<32x1xf32>
    %241 = math.tanh %240 : vector<32x1xf32>
    %c1_220 = arith.constant 1 : index
    %c0_221 = arith.constant 0 : index
    %242 = tpu.strided_load %arg16[%c1_220, %c0_221] {strides = array<i32: 2, 1>} : memref<72x16xf32, #tpu.memory_space<vmem>>, vector<32x1xf32>
    tpu.strided_store %arg16[%c1_220, %c0_221], %241 {strides = array<i32: 2, 1>} : memref<72x16xf32, #tpu.memory_space<vmem>>, vector<32x1xf32>
    %cst_222 = arith.constant 0.000000e+00 : f32
    %243 = vector.broadcast %cst_222 : f32 to vector<32x1xf32>
    %244 = vector.broadcast %213 : vector<1x1xf32> to vector<32x1xf32>
    %245 = arith.addf %243, %244 : vector<32x1xf32>
    %c5_223 = arith.constant 5 : index
    %c0_224 = arith.constant 0 : index
    %246 = vector.load %arg15[%c5_223, %c0_224] : memref<72x16xf32, #tpu.memory_space<vmem>>, vector<32x8xf32>
    %c1_225 = arith.constant 1 : index
    %c0_226 = arith.constant 0 : index
    %c0_227 = arith.constant 0 : index
    %247 = vector.load %arg11[%c1_225, %c0_226, %c0_227] : memref<8x8x1xf32, #tpu.memory_space<vmem>>, vector<1x8x1xf32>
    %248 = vector.shape_cast %247 : vector<1x8x1xf32> to vector<8x1xf32>
    %cst_228 = arith.constant dense<0.000000e+00> : vector<32x1xf32>
    %249 = tpu.matmul %246, %248, %cst_228 {dimension_numbers = #tpu.dot_dimension_numbers<[1], [0], [0], [1], [0, 0, 1, 1], [], []>} : vector<32x8xf32>, vector<8x1xf32>, vector<32x1xf32> -> vector<32x1xf32>
    %250 = arith.addf %245, %249 : vector<32x1xf32>
    %c4_229 = arith.constant 4 : index
    %c0_230 = arith.constant 0 : index
    %251 = vector.load %arg15[%c4_229, %c0_230] : memref<72x16xf32, #tpu.memory_space<vmem>>, vector<32x8xf32>
    %c3_231 = arith.constant 3 : index
    %c0_232 = arith.constant 0 : index
    %c0_233 = arith.constant 0 : index
    %252 = vector.load %arg11[%c3_231, %c0_232, %c0_233] : memref<8x8x1xf32, #tpu.memory_space<vmem>>, vector<1x8x1xf32>
    %253 = vector.shape_cast %252 : vector<1x8x1xf32> to vector<8x1xf32>
    %cst_234 = arith.constant dense<0.000000e+00> : vector<32x1xf32>
    %254 = tpu.matmul %251, %253, %cst_234 {dimension_numbers = #tpu.dot_dimension_numbers<[1], [0], [0], [1], [0, 0, 1, 1], [], []>} : vector<32x8xf32>, vector<8x1xf32>, vector<32x1xf32> -> vector<32x1xf32>
    %255 = arith.addf %250, %254 : vector<32x1xf32>
    %c3_235 = arith.constant 3 : index
    %c0_236 = arith.constant 0 : index
    %256 = vector.load %arg15[%c3_235, %c0_236] : memref<72x16xf32, #tpu.memory_space<vmem>>, vector<32x8xf32>
    %c5_237 = arith.constant 5 : index
    %c0_238 = arith.constant 0 : index
    %c0_239 = arith.constant 0 : index
    %257 = vector.load %arg11[%c5_237, %c0_238, %c0_239] : memref<8x8x1xf32, #tpu.memory_space<vmem>>, vector<1x8x1xf32>
    %258 = vector.shape_cast %257 : vector<1x8x1xf32> to vector<8x1xf32>
    %cst_240 = arith.constant dense<0.000000e+00> : vector<32x1xf32>
    %259 = tpu.matmul %256, %258, %cst_240 {dimension_numbers = #tpu.dot_dimension_numbers<[1], [0], [0], [1], [0, 0, 1, 1], [], []>} : vector<32x8xf32>, vector<8x1xf32>, vector<32x1xf32> -> vector<32x1xf32>
    %260 = arith.addf %255, %259 : vector<32x1xf32>
    %c2_241 = arith.constant 2 : index
    %c0_242 = arith.constant 0 : index
    %261 = vector.load %arg15[%c2_241, %c0_242] : memref<72x16xf32, #tpu.memory_space<vmem>>, vector<32x8xf32>
    %c7_243 = arith.constant 7 : index
    %c0_244 = arith.constant 0 : index
    %c0_245 = arith.constant 0 : index
    %262 = vector.load %arg11[%c7_243, %c0_244, %c0_245] : memref<8x8x1xf32, #tpu.memory_space<vmem>>, vector<1x8x1xf32>
    %263 = vector.shape_cast %262 : vector<1x8x1xf32> to vector<8x1xf32>
    %cst_246 = arith.constant dense<0.000000e+00> : vector<32x1xf32>
    %264 = tpu.matmul %261, %263, %cst_246 {dimension_numbers = #tpu.dot_dimension_numbers<[1], [0], [0], [1], [0, 0, 1, 1], [], []>} : vector<32x8xf32>, vector<8x1xf32>, vector<32x1xf32> -> vector<32x1xf32>
    %265 = arith.addf %260, %264 : vector<32x1xf32>
    %266 = math.tanh %265 : vector<32x1xf32>
    %c0_247 = arith.constant 0 : index
    %c0_248 = arith.constant 0 : index
    %267 = tpu.strided_load %arg16[%c0_247, %c0_248] {strides = array<i32: 2, 1>} : memref<72x16xf32, #tpu.memory_space<vmem>>, vector<32x1xf32>
    tpu.strided_store %arg16[%c0_247, %c0_248], %266 {strides = array<i32: 2, 1>} : memref<72x16xf32, #tpu.memory_space<vmem>>, vector<32x1xf32>
    %c0_249 = arith.constant 0 : index
    %c0_250 = arith.constant 0 : index
    %268 = vector.load %arg16[%c0_249, %c0_250] : memref<72x16xf32, #tpu.memory_space<vmem>>, vector<64x1xf32>
    %c0_251 = arith.constant 0 : index
    %c0_252 = arith.constant 0 : index
    %c0_253 = arith.constant 0 : index
    %269 = vector.load %arg14[%c0_251, %c0_252, %c0_253] : memref<1x64x1xf32, #tpu.memory_space<vmem>>, vector<1x64x1xf32>
    %270 = vector.shape_cast %269 : vector<1x64x1xf32> to vector<64x1xf32>
    %271 = vector.shape_cast %268 : vector<64x1xf32> to vector<1x64x1xf32>
    tpu.vector_store %arg14[%c0_251, %c0_252, %c0_253], %271 {strides = array<i32>} : memref<1x64x1xf32, #tpu.memory_space<vmem>>, vector<1x64x1xf32>,
    return
  }
  func.func @transform_0(%arg0: i32) -> (i32, i32, i32) {
    %c0_i32 = arith.constant 0 : i32
    %c0_i32_0 = arith.constant 0 : i32
    %c0_i32_1 = arith.constant 0 : i32
    return %arg0, %c0_i32, %c0_i32_0 : i32, i32, i32
  }
  func.func @transform_1(%arg0: i32) -> (i32, i32, i32) {
    %c0_i32 = arith.constant 0 : i32
    %c0_i32_0 = arith.constant 0 : i32
    %c0_i32_1 = arith.constant 0 : i32
    %c0_i32_2 = arith.constant 0 : i32
    return %c0_i32, %c0_i32_0, %c0_i32_1 : i32, i32, i32
  }
  func.func @transform_2(%arg0: i32) -> (i32, i32) {
    %c0_i32 = arith.constant 0 : i32
    %c0_i32_0 = arith.constant 0 : i32
    %c0_i32_1 = arith.constant 0 : i32
    return %c0_i32, %c0_i32_0 : i32, i32
  }
  func.func @transform_3(%arg0: i32) -> (i32, i32) {
    %c0_i32 = arith.constant 0 : i32
    %c0_i32_0 = arith.constant 0 : i32
    %c0_i32_1 = arith.constant 0 : i32
    return %c0_i32, %c0_i32_0 : i32, i32
  }
  func.func @transform_4(%arg0: i32) -> (i32, i32, i32) {
    %c0_i32 = arith.constant 0 : i32
    %c0_i32_0 = arith.constant 0 : i32
    %c0_i32_1 = arith.constant 0 : i32
    %c0_i32_2 = arith.constant 0 : i32
    return %c0_i32, %c0_i32_0, %c0_i32_1 : i32, i32, i32
  }
  func.func @transform_5(%arg0: i32) -> (i32, i32) {
    %c0_i32 = arith.constant 0 : i32
    %c0_i32_0 = arith.constant 0 : i32
    %c0_i32_1 = arith.constant 0 : i32
    return %c0_i32, %c0_i32_0 : i32, i32
  }
  func.func @transform_6(%arg0: i32) -> (i32, i32) {
    %c0_i32 = arith.constant 0 : i32
    %c0_i32_0 = arith.constant 0 : i32
    %c0_i32_1 = arith.constant 0 : i32
    return %c0_i32, %c0_i32_0 : i32, i32
  }
  func.func @transform_7(%arg0: i32) -> (i32, i32, i32) {
    %c0_i32 = arith.constant 0 : i32
    %c0_i32_0 = arith.constant 0 : i32
    %c0_i32_1 = arith.constant 0 : i32
    %c0_i32_2 = arith.constant 0 : i32
    return %c0_i32, %c0_i32_0, %c0_i32_1 : i32, i32, i32
  }
  func.func @transform_8(%arg0: i32) -> (i32, i32) {
    %c0_i32 = arith.constant 0 : i32
    %c0_i32_0 = arith.constant 0 : i32
    %c0_i32_1 = arith.constant 0 : i32
    return %c0_i32, %c0_i32_0 : i32, i32
  }
  func.func @transform_9(%arg0: i32) -> (i32, i32) {
    %c0_i32 = arith.constant 0 : i32
    %c0_i32_0 = arith.constant 0 : i32
    %c0_i32_1 = arith.constant 0 : i32
    return %c0_i32, %c0_i32_0 : i32, i32
  }
  func.func @transform_10(%arg0: i32) -> (i32, i32, i32) {
    %c0_i32 = arith.constant 0 : i32
    %c0_i32_0 = arith.constant 0 : i32
    %c0_i32_1 = arith.constant 0 : i32
    %c0_i32_2 = arith.constant 0 : i32
    return %c0_i32, %c0_i32_0, %c0_i32_1 : i32, i32, i32
  }
  func.func @transform_11(%arg0: i32) -> (i32, i32) {
    %c0_i32 = arith.constant 0 : i32
    %c0_i32_0 = arith.constant 0 : i32
    %c0_i32_1 = arith.constant 0 : i32
    return %c0_i32, %c0_i32_0 : i32, i32
  }
  func.func @transform_12(%arg0: i32) -> (i32, i32) {
    %c0_i32 = arith.constant 0 : i32
    %c0_i32_0 = arith.constant 0 : i32
    %c0_i32_1 = arith.constant 0 : i32
    return %c0_i32, %c0_i32_0 : i32, i32
  }
  func.func @transform_13(%arg0: i32) -> (i32, i32, i32) {
    %c0_i32 = arith.constant 0 : i32
    %c0_i32_0 = arith.constant 0 : i32
    %c0_i32_1 = arith.constant 0 : i32
    return %arg0, %c0_i32, %c0_i32_0 : i32, i32, i32
  }
}

</mosaic_0001>

<bundles_post_ra>
// kernel: tpu_custom_call.1
= control target key start
LH: loop header
LB: loop body
LE: loop exit
PB: predicated region body
PF: predicated region fallthrough
CT: control target
= control target key end

     0   :  { %s3788_s27 = smov 0   ;;  %s4070_s0 = inlined_call_operand.vmem [shape: f32[2,64,1], index: 0, kind: input, shape index: {}]   ;;  %s4071_s1 = inlined_call_operand.vmem [shape: f32[8,1,8], index: 1, kind: input, shape index: {}]   ;;  %s4072_s2 = inlined_call_operand.vmem [shape: f32[1,8], index: 2, kind: input, shape index: {}]   ;;  %s4073_s3 = inlined_call_operand.vmem [shape: f32[1,8], index: 3, kind: input, shape index: {}]   ;;  %s4074_s4 = inlined_call_operand.vmem [shape: f32[8,8,16], index: 4, kind: input, shape index: {}]   ;;  %s4075_s5 = inlined_call_operand.vmem [shape: f32[1,16], index: 5, kind: input, shape index: {}]   ;;  %s4076_s6 = inlined_call_operand.vmem [shape: f32[1,16], index: 6, kind: input, shape index: {}]   ;;  %s4077_s7 = inlined_call_operand.vmem [shape: f32[8,16,8], index: 7, kind: input, shape index: {}]   ;;  %s4078_s8 = inlined_call_operand.vmem [shape: f32[1,8], index: 8, kind: input, shape index: {}]   ;;  %s4079_s9 = inlined_call_operand.vmem [shape: f32[1,8], index: 9, kind: input, shape index: {}]   ;;  %s4080_s10 = inlined_call_operand.vmem [shape: f32[8,8,1], index: 10, kind: input, shape index: {}]   ;;  %s4081_s11 = inlined_call_operand.<no memory space> [shape: f32[1,1], index: 11, kind: input, shape index: {}]   ;;  %s4082_s13 = inlined_call_operand.vmem [shape: f32[2,64,1], index: 13, kind: output, shape index: {}]   ;;  %s4083_s12 = inlined_call_operand.<no memory space> [shape: f32[1,1], index: 12, kind: input, shape index: {}]  }
   0x1   :  { %v18_v0 = vstv %s4081_s11 }
   0x2   :  { %19 = vst [vmem:[#allocation4] sm:$0x1] %v18_v0 }
   0x3 LB: > { %s3294_s28 = sadd.s32 4294967295, %s3711_s27   ;;  %p3298_p0 = scmp.ge.s32.totalorder %s3711_s27, 1  ;;  %s3711_s27 = sphi %s3788_s27, %s27_s27  }
   0x4   : > { %p391_p1 = scmp.lt.s32.totalorder %s3711_s27, 3 }
   0x6   : > { %p392_p2 = pnand %p3298_p0, %p391_p1 }
   0x7   : > { %p435_p3 = scmp.lt.s32.totalorder (!%p392_p2), %s3294_s28, 1 }
   0x8   : > { %395 = sbr.rel (%p392_p2) target bundleno = 941 (0x3ad), region = 72 }
   0xd   : > { %v3713_v1 = vmov 0   ;;  %s4085_s28 = smov (!%p435_p3, %s3294_s28), 1  ;;  %vm455_vm0 = vcmask 7168   ;;  %vm464_vm1 = vcmask 3075   ;;  %vm468_vm2 = vcmask 1025   ;;  %v881_v42 = vld [vmem:[%s4074_s4] sm:$0xff] }
   0xe   : > { %3688 = vset.pattern.permute.xlu1 %v3713_v1  ;;  %3687 = vset.pattern.permute.xlu0 %v3713_v1  ;;  %s3419_s11 = sshll.u32 %s4085_s28, 6  ;;  %vm466_vm3 = vcmask 2050   ;;  %vm470_vm4 = vcmask 6150   ;;  %vm472_vm5 = vcmask 5125   ;;  %vm474_vm6 = vcmask 4100   ;;  %v3323_v43 = vld [vmem:[%s4074_s4 + $0x8] sm:$0xff] }
   0xf   : > { %s439_s30 = scalar_lea.vmem %s4070_s0, %s3419_s11  ;;  %v3827_v44 = vld [vmem:[%s4074_s4 + $0x10] sm:$0xff]  ;;  %3517 = vmatprep.subr.mxu0 %v881_v42  ;;  %3522 = vmatprep.subr.mxu1 %v3323_v43  ;;  %v3833_v45 = vld [vmem:[%s4074_s4 + $0x18] sm:$0xff]  ;;  %vm854_vm7 = vcmask 64512   ;;  %vm859_vm8 = vcmask 60419   ;;  %vm861_vm9 = vcmask 59394   ;;  %vm863_vm10 = vcmask 58369   ;;  %s444_s29 = scalar_lea.vmem %s4082_s13, %s3419_s11 }
  0x10   : > { %v448_v2 = vld [vmem:[%s439_s30 + $0x18] sm:$0xff]  ;;  %v449_v3 = vld [vmem:[%s439_s30 + $0x20] sm:$0xff]  ;;  %v450_v4 = vld [vmem:[%s439_s30 + $0x28] sm:$0xff]  ;;  %3518 = vmatpush3.msra.mxu0 %v881_v42  ;;  %3523 = vmatpush3.msra.mxu1 %v3323_v43  ;;  %vm865_vm13 = vcmask 63494   ;;  %vm867_vm14 = vcmask 62469   ;;  %vm869_vm15 = vcmask 61444  }
  0x11   : > { %459 = vst.msk [vmem:[#allocation2 + $0x1b] sm:$0xff] %vm455_vm0, %v448_v2  ;;  %460 = vst.msk [vmem:[#allocation2 + $0x23] sm:$0xff] %vm455_vm0, %v449_v3  ;;  %v445_v5 = vld [vmem:[%s439_s30] sm:$0xff]  ;;  %v446_v6 = vld [vmem:[%s439_s30 + $0x8] sm:$0xff]  ;;  %3527 = vmatprep.subr.mxu0 %v3827_v44  ;;  %3532 = vmatprep.subr.mxu1 %v3833_v45 }
  0x12   : > { %461 = vst.msk [vmem:[#allocation2 + $0x2b] sm:$0xff] %vm455_vm0, %v450_v4  ;;  %v451_v7 = vld [vmem:[%s439_s30 + $0x30] sm:$0xff]  ;;  %456 = vst.msk [vmem:[#allocation2 + $0x3] sm:$0xff] %vm455_vm0, %v445_v5  ;;  %v452_v8 = vld [vmem:[%s439_s30 + $0x38] sm:$0xff] }
  0x13   : > { %457 = vst.msk [vmem:[#allocation2 + $0xb] sm:$0xff] %vm455_vm0, %v446_v6  ;;  %462 = vst.msk [vmem:[#allocation2 + $0x33] sm:$0xff] %vm455_vm0, %v451_v7  ;;  %v447_v9 = vld [vmem:[%s439_s30 + $0x10] sm:$0xff]  ;;  %v3304_v2 = vld [vmem:[%s4071_s1] ss:$0 sm:$0xff] }
  0x14   : > { %465 = vst.msk [vmem:[#allocation2 - $0x3] sm:$0x8] %vm464_vm1, %v445_v5  ;;  %v3306_v3 = vld [vmem:[%s4071_s1 + $0x1] ss:$0 sm:$0xff] }
  0x15   : > { %469 = vst.msk [vmem:[#allocation2 + $0x1] sm:$0x2] %vm468_vm2, %v445_v5 }
  0x16   : > { %467 = vst.msk [vmem:[#allocation2 - $0x1] sm:$0x4] %vm466_vm3, %v445_v5  ;;  %vm1588_vm3 = vcmask 125952  }
  0x17   : > { %463 = vst.msk [vmem:[#allocation2 + $0x3b] sm:$0xff] %vm455_vm0, %v452_v8  ;;  %458 = vst.msk [vmem:[#allocation2 + $0x13] sm:$0xff] %vm455_vm0, %v447_v9  ;;  %v3303_v9 = vld [vmem:[%s4072_s2] ss:$0 sm:$0xff] }
  0x18   : > { %471 = vst.msk [vmem:[#allocation2 + $0x3d] sm:$0x40] %vm470_vm4, %v452_v8 }
  0x19   : > { %473 = vst.msk [vmem:[#allocation2 + $0x3f] sm:$0x20] %vm472_vm5, %v452_v8  ;;  %v488_v10 = vld [vmem:[#allocation2 + $0x20] ss:$2 sm:$0xff]  ;;  %v531_v17 = vld [vmem:[#allocation2 + $0x21] ss:$2 sm:$0xff] }
  0x1a   : > { %475 = vst.msk [vmem:[#allocation2 + $0x41] sm:$0x10] %vm474_vm6, %v452_v8  ;;  %504 = vperm.xlu1 %3688, %v488_v10   ;;  %v575_v21 = vld [vmem:[#allocation2 + $0x22] ss:$2 sm:$0xff]  ;;  %v615_v23 = vld [vmem:[#allocation2 + $0x3] ss:$2 sm:$0xff] }
  0x1b   : > { %v619_v25 = vld [vmem:[#allocation2 + $0x23] ss:$2 sm:$0xff]  ;;  %v659_v27 = vld [vmem:[#allocation2 + $0x4] ss:$2 sm:$0xff]  ;;  %v3308_v8 = vld [vmem:[%s4071_s1 + $0x2] ss:$0 sm:$0xff] }
  0x1c   : > { %v484_v11 = vld [vmem:[#allocation2] ss:$2 sm:$0xff]  ;;  %v707_v33 = vld [vmem:[#allocation2 + $0x25] ss:$2 sm:$0xff]  ;;  %vm1590_vm5 = vcmask 130048  }
  0x1d   : > { %494 = vperm.xlu0 %3687, %v484_v11   ;;  %v527_v15 = vld [vmem:[#allocation2 + $0x1] ss:$2 sm:$0xff]  ;;  %v571_v19 = vld [vmem:[#allocation2 + $0x2] ss:$2 sm:$0xff] }
  0x1e   : > { %v490_v12 = vld [vmem:[#allocation2 + $0x30] ss:$2 sm:$0xff]  ;;  %v529_v14 = vld [vmem:[#allocation2 + $0x11] ss:$2 sm:$0xff] }
  0x1f   : > { %v486_v13 = vld [vmem:[#allocation2 + $0x10] ss:$2 sm:$0xff]  ;;  %509 = vperm.xlu1 %3688, %v490_v12   ;;  %v533_v16 = vld [vmem:[#allocation2 + $0x31] ss:$2 sm:$0xff]  ;;  %v3310_v12 = vld [vmem:[%s4071_s1 + $0x3] ss:$0 sm:$0xff] }
  0x20   : > { %v573_v18 = vld [vmem:[#allocation2 + $0x12] ss:$2 sm:$0xff]  ;;  %v617_v22 = vld [vmem:[#allocation2 + $0x13] ss:$2 sm:$0xff] }
  0x21   : > { %499 = vperm.xlu0 %3687, %v486_v13   ;;  %v577_v20 = vld [vmem:[#allocation2 + $0x32] ss:$2 sm:$0xff]  ;;  %v621_v24 = vld [vmem:[#allocation2 + $0x33] ss:$2 sm:$0xff] }
  0x22   : > { %v661_v26 = vld [vmem:[#allocation2 + $0x14] ss:$2 sm:$0xff]  ;;  %v663_v29 = vld [vmem:[#allocation2 + $0x24] ss:$2 sm:$0xff]  ;;  %v705_v30 = vld [vmem:[#allocation2 + $0x15] ss:$2 sm:$0xff] }
  0x23   : > { %543 = vperm.xlu1 %3688, %v529_v14   ;;  %v665_v28 = vld [vmem:[#allocation2 + $0x34] ss:$2 sm:$0xff]  ;;  %v703_v31 = vld [vmem:[#allocation2 + $0x5] ss:$2 sm:$0xff]  ;;  %v709_v32 = vld [vmem:[#allocation2 + $0x35] ss:$2 sm:$0xff] }
  0x24   : > { %v749_v34 = vld [vmem:[#allocation2 + $0x16] ss:$2 sm:$0xff]  ;;  %v747_v35 = vld [vmem:[#allocation2 + $0x6] ss:$2 sm:$0xff]  ;;  %v793_v38 = vld [vmem:[#allocation2 + $0x17] ss:$2 sm:$0xff] }
  0x25   : > { %538 = vperm.xlu0 %3687, %v527_v15   ;;  %v753_v36 = vld [vmem:[#allocation2 + $0x36] ss:$2 sm:$0xff]  ;;  %v751_v37 = vld [vmem:[#allocation2 + $0x26] ss:$2 sm:$0xff]  ;;  %v791_v39 = vld [vmem:[#allocation2 + $0x7] ss:$2 sm:$0xff] }
  0x26   : > { %v797_v40 = vld [vmem:[#allocation2 + $0x37] ss:$2 sm:$0xff]  ;;  %v795_v41 = vld [vmem:[#allocation2 + $0x27] ss:$2 sm:$0xff] }
  0x27   : > { %553 = vperm.xlu1 %3688, %v533_v16  }
  0x29   : > { %548 = vperm.xlu0 %3687, %v531_v17  }
  0x2b   : > { %587 = vperm.xlu1 %3688, %v573_v18  }
  0x2d   : > { %582 = vperm.xlu0 %3687, %v571_v19  }
  0x2f   : > { %597 = vperm.xlu1 %3688, %v577_v20  }
  0x31   : > { %592 = vperm.xlu0 %3687, %v575_v21   ;;  %v3312_v21 = vld [vmem:[%s4071_s1 + $0x4] ss:$0 sm:$0xff] }
  0x33   : > { %631 = vperm.xlu1 %3688, %v617_v22  }
  0x35   : > { %626 = vperm.xlu0 %3687, %v615_v23  }
  0x37   : > { %641 = vperm.xlu1 %3688, %v621_v24  }
  0x39   : > { %636 = vperm.xlu0 %3687, %v619_v25  }
  0x3b   : > { %675 = vperm.xlu1 %3688, %v661_v26  }
  0x3d   : > { %670 = vperm.xlu0 %3687, %v659_v27  }
  0x3f   : > { %685 = vperm.xlu1 %3688, %v665_v28   ;;  %v3314_v28 = vld [vmem:[%s4071_s1 + $0x5] ss:$0 sm:$0xff] }
  0x41   : > { %680 = vperm.xlu0 %3687, %v663_v29  }
  0x43   : > { %719 = vperm.xlu1 %3688, %v705_v30  }
  0x45   : > { %714 = vperm.xlu0 %3687, %v703_v31  }
  0x47   : > { %729 = vperm.xlu1 %3688, %v709_v32  }
  0x49   : > { %724 = vperm.xlu0 %3687, %v707_v33  }
  0x4b   : > { %763 = vperm.xlu1 %3688, %v749_v34  }
  0x4d   : > { %758 = vperm.xlu0 %3687, %v747_v35  }
  0x4f   : > { %773 = vperm.xlu1 %3688, %v753_v36  }
  0x51   : > { %768 = vperm.xlu0 %3687, %v751_v37  }
  0x53   : > { %807 = vperm.xlu1 %3688, %v793_v38  }
  0x55   : > { %802 = vperm.xlu0 %3687, %v791_v39   ;;  %v3316_v39 = vld [vmem:[%s4071_s1 + $0x6] ss:$0 sm:$0xff] }
  0x57   : > { %817 = vperm.xlu1 %3688, %v797_v40  }
  0x59   : > { %812 = vperm.xlu0 %3687, %v795_v41  }
  0x95   : > { %v505_v46 = vpop.permute.xlu1 %504 }
  0x96   : > { %v520_v18 = vmul.f32 %v3304_v2, %v505_v46 }
  0x98   : > { %v495_v47 = vpop.permute.xlu0 %494  ;;  %v524_v35 = vadd.f32 %v3303_v9, %v520_v18 }
  0x99   : > { %v518_v7 = vmul.f32 %v3304_v2, %v495_v47 }
  0x9a   : > { %v510_v48 = vpop.permute.xlu1 %509 }
  0x9b   : > { %v521_v14 = vmul.f32 %v3304_v2, %v510_v48  ;;  %v522_v19 = vadd.f32 %v3303_v9, %v518_v7 }
  0x9c   : > { %v500_v49 = vpop.permute.xlu0 %499 }
  0x9d   : > { %v519_v5 = vmul.f32 %v3304_v2, %v500_v49  ;;  %v525_v30 = vadd.f32 %v3303_v9, %v521_v14 }
  0x9e   : > { %v544_v50 = vpop.permute.xlu1 %543 }
  0x9f   : > { %v563_v10 = vmul.f32 %v3306_v3, %v544_v50  ;;  %v523_v15 = vadd.f32 %v3303_v9, %v519_v5 }
  0xa0   : > { %v539_v51 = vpop.permute.xlu0 %538 }
  0xa1   : > { %v562_v11 = vmul.f32 %v3306_v3, %v539_v51  ;;  %v567_v22 = vadd.f32 %v563_v10, %v523_v15 }
  0xa2   : > { %v554_v52 = vpop.permute.xlu1 %553 }
  0xa3   : > { %v565_v23 = vmul.f32 %v3306_v3, %v554_v52  ;;  %v566_v25 = vadd.f32 %v562_v11, %v522_v19 }
  0xa4   : > { %v549_v53 = vpop.permute.xlu0 %548 }
  0xa5   : > { %v564_v26 = vmul.f32 %v3306_v3, %v549_v53  ;;  %v569_v40 = vadd.f32 %v565_v23, %v525_v30 }
  0xa6   : > { %v588_v54 = vpop.permute.xlu1 %587 }
  0xa7   : > { %v607_v16 = vmul.f32 %v3308_v8, %v588_v54  ;;  %v568_v46 = vadd.f32 %v564_v26, %v524_v35 }
  0xa8   : > { %v583_v55 = vpop.permute.xlu0 %582 }
  0xa9   : > { %v606_v20 = vmul.f32 %v3308_v8, %v583_v55  ;;  %v611_v31 = vadd.f32 %v607_v16, %v567_v22 }
  0xaa   : > { %v598_v56 = vpop.permute.xlu1 %597 }
  0xab   : > { %v609_v32 = vmul.f32 %v3308_v8, %v598_v56  ;;  %v610_v36 = vadd.f32 %v606_v20, %v566_v25 }
  0xac   : > { %v593_v57 = vpop.permute.xlu0 %592 }
  0xad   : > { %v608_v37 = vmul.f32 %v3308_v8, %v593_v57  ;;  %v613_v51 = vadd.f32 %v609_v32, %v569_v40  ;;  %v3335_v40 = vld [vmem:[%s4074_s4 + $0x28] sm:$0xff] }
  0xae   : > { %v632_v58 = vpop.permute.xlu1 %631 }
  0xaf   : > { %v651_v24 = vmul.f32 %v3310_v12, %v632_v58  ;;  %v612_v56 = vadd.f32 %v608_v37, %v568_v46 }
  0xb0   : > { %v627_v59 = vpop.permute.xlu0 %626 }
  0xb1   : > { %v650_v27 = vmul.f32 %v3310_v12, %v627_v59  ;;  %v655_v41 = vadd.f32 %v651_v24, %v611_v31 }
  0xb2   : > { %v642_v60 = vpop.permute.xlu1 %641 }
  0xb3   : > { %v653_v42 = vmul.f32 %v3310_v12, %v642_v60  ;;  %v654_v47 = vadd.f32 %v650_v27, %v610_v36 }
  0xb4   : > { %v637_v61 = vpop.permute.xlu0 %636 }
  0xb5   : > { %v652_v48 = vmul.f32 %v3310_v12, %v637_v61  ;;  %v657_v60 = vadd.f32 %v653_v42, %v613_v51  ;;  %v3319_v12 = vld [vmem:[%s4073_s3] ss:$0 sm:$0xff] }
  0xb6   : > { %v676_v62 = vpop.permute.xlu1 %675 }
  0xb7   : > { %v695_v33 = vmul.f32 %v3312_v21, %v676_v62  ;;  %v3318_v62 = vld [vmem:[%s4071_s1 + $0x7] ss:$0 sm:$0xff]  ;;  %v656_v3 = vadd.f32 %v652_v48, %v612_v56 }
  0xb8   : > { %v671_v63 = vpop.permute.xlu0 %670  ;;  %v1603_v56 = vld [vmem:[%s4077_s7] sm:$0xff] }
  0xb9   : > { %v694_v38 = vmul.f32 %v3312_v21, %v671_v63  ;;  %v699_v52 = vadd.f32 %v695_v33, %v655_v41 }
  0xba   : > { %v686_v0 = vpop.permute.xlu1 %685 }
  0xbb   : > { %v697_v53 = vmul.f32 %v3312_v21, %v686_v0  ;;  %v698_v57 = vadd.f32 %v694_v38, %v654_v47  ;;  %v3341_v47 = vld [vmem:[%s4074_s4 + $0x38] sm:$0xff] }
  0xbc   : > { %v681_v1 = vpop.permute.xlu0 %680 }
  0xbd   : > { %v696_v58 = vmul.f32 %v3312_v21, %v681_v1 }
  0xbe   : > { %v720_v4 = vpop.permute.xlu1 %719 }
  0xbf   : > { %v739_v43 = vmul.f32 %v3314_v28, %v720_v4  ;;  %v700_v10 = vadd.f32 %v696_v58, %v656_v3  ;;  %v3714_v58 = vmov 0.0  }
  0xc0   : > { %v715_v6 = vpop.permute.xlu0 %714 }
  0xc1   : > { %v738_v49 = vmul.f32 %v3314_v28, %v715_v6  ;;  %v743_v63 = vadd.f32 %v739_v43, %v699_v52  ;;  %v701_v6 = vadd.f32 %v697_v53, %v657_v60  ;;  %v3320_v60 = vld [vmem:[%s4075_s5] ss:$0 sm:$0xff] }
  0xc2   : > { %v730_v13 = vpop.permute.xlu1 %729 }
  0xc3   : > { %v741_v2 = vmul.f32 %v3314_v28, %v730_v13  ;;  %v742_v61 = vadd.f32 %v738_v49, %v698_v57  ;;  %v3348_v57 = vld [vmem:[%s4077_s7 + $0x20] sm:$0xff] }
  0xc4   : > { %v725_v17 = vpop.permute.xlu0 %724 }
  0xc5   : > { %v740_v4 = vmul.f32 %v3314_v28, %v725_v17  ;;  %v745_v15 = vadd.f32 %v741_v2, %v701_v6 }
  0xc6   : > { %v764_v29 = vpop.permute.xlu1 %763 }
  0xc7   : > { %v783_v54 = vmul.f32 %v3316_v39, %v764_v29  ;;  %v744_v13 = vadd.f32 %v740_v4, %v700_v10 }
  0xc8   : > { %v759_v34 = vpop.permute.xlu0 %758 }
  0xc9   : > { %v782_v59 = vmul.f32 %v3316_v39, %v759_v34  ;;  %v787_v7 = vadd.f32 %v783_v54, %v743_v63  ;;  %v1604_v54 = vld [vmem:[%s4077_s7 + $0x8] sm:$0xff] }
  0xca   : > { %v774_v50 = vpop.permute.xlu1 %773 }
  0xcb   : > { %v785_v0 = vmul.f32 %v3316_v39, %v774_v50  ;;  %v786_v11 = vadd.f32 %v782_v59, %v742_v61  ;;  %v3353_v59 = vld [vmem:[%s4077_s7 + $0x48] sm:$0xff] }
  0xcc   : > { %v769_v55 = vpop.permute.xlu0 %768 }
  0xcd   : > { %v784_v1 = vmul.f32 %v3316_v39, %v769_v55  ;;  %v789_v19 = vadd.f32 %v785_v0, %v745_v15  ;;  %v3332_v39 = vld [vmem:[%s4074_s4 + $0x20] sm:$0xff]  ;;  %v3349_v55 = vld [vmem:[%s4077_s7 + $0x28] sm:$0xff] }
  0xce   : > { %v808_v5 = vpop.permute.xlu1 %807 }
  0xcf   : > { %v827_v8 = vmul.f32 %v3318_v62, %v808_v5  ;;  %v788_v23 = vadd.f32 %v784_v1, %v744_v13 }
  0xd0   : > { %v803_v9 = vpop.permute.xlu0 %802 }
  0xd1   : > { %v826_v14 = vmul.f32 %v3318_v62, %v803_v9  ;;  %v831_v16 = vadd.f32 %v827_v8, %v787_v7 }
  0xd2   : > { %v818_v18 = vpop.permute.xlu1 %817 }
  0xd3   : > { %v830_v17 = vadd.f32 %v826_v14, %v786_v11  ;;  %vm835_vm11 = vcmp.ge.f32.partialorder %v831_v16, 0.0  ;;  %v845_v20 = vmul.f32 %v3319_v12, %v831_v16  ;;  %v829_v21 = vmul.f32 %v3318_v62, %v818_v18 }
  0xd4   : > { %v813_v22 = vpop.permute.xlu0 %812 }
  0xd5   : > { %vm834_vm12 = vcmp.ge.f32.partialorder %v830_v17, 0.0  ;;  %v844_v24 = vmul.f32 %v3319_v12, %v830_v17  ;;  %v828_v25 = vmul.f32 %v3318_v62, %v813_v22  ;;  %v849_v26 = vsel %vm835_vm11, %v831_v16, %v845_v20  ;;  %v3357_v62 = vld [vmem:[%s4077_s7 + $0x68] sm:$0xff] }
  0xd6   : > { %v833_v27 = vadd.f32 %v829_v21, %v789_v19  ;;  %856 = vst.msk [vmem:[#allocation2 + $0xb] sm:$0xff] %vm854_vm7, %v849_v26 }
  0xd7   : > { %v848_v28 = vsel %vm834_vm12, %v830_v17, %v844_v24  ;;  %v832_v29 = vadd.f32 %v828_v25, %v788_v23  ;;  %v3344_v25 = vld [vmem:[%s4076_s6] ss:$0 sm:$0xff] }
  0xd8   : > { %855 = vst.msk [vmem:[#allocation2 + $0x3] sm:$0xff] %vm854_vm7, %v848_v28  ;;  %vm837_vm1 = vcmp.ge.f32.partialorder %v833_v27, 0.0  ;;  %v847_v30 = vmul.f32 %v3319_v12, %v833_v27 }
  0xd9   : > { %860 = vst.msk [vmem:[#allocation2 - $0x3] sm:$0x8] %vm859_vm8, %v848_v28  ;;  %vm836_vm2 = vcmp.ge.f32.partialorder %v832_v29, 0.0  ;;  %v846_v31 = vmul.f32 %v3319_v12, %v832_v29 }
  0xda   : > { %862 = vst.msk [vmem:[#allocation2 - $0x1] sm:$0x4] %vm861_vm9, %v848_v28  ;;  %v851_v32 = vsel %vm837_vm1, %v833_v27, %v847_v30 }
  0xdb   : > { %864 = vst.msk [vmem:[#allocation2 + $0x1] sm:$0x2] %vm863_vm10, %v848_v28  ;;  %v850_v33 = vsel %vm836_vm2, %v832_v29, %v846_v31 }
  0xdc   : > { %866 = vst.msk [vmem:[#allocation2 + $0x1d] sm:$0x40] %vm865_vm13, %v851_v32 }
  0xdd   : > { %868 = vst.msk [vmem:[#allocation2 + $0x1f] sm:$0x20] %vm867_vm14, %v851_v32 }
  0xde   : > { %870 = vst.msk [vmem:[#allocation2 + $0x21] sm:$0x10] %vm869_vm15, %v851_v32 }
  0xdf   : > { %871 = vst.msk [vmem:[#allocation2 + $0x23] sm:$0x8] %vm859_vm8, %v851_v32  ;;  %v1139_v41 = vld [vmem:[#allocation2 + $0x3] ss:$2 sm:$0xff]  ;;  %v1226_v46 = vld [vmem:[#allocation2 + $0x4] ss:$2 sm:$0xff] }
  0xe0   : > { %858 = vst.msk [vmem:[#allocation2 + $0x1b] sm:$0xff] %vm854_vm7, %v851_v32  ;;  %857 = vst.msk [vmem:[#allocation2 + $0x13] sm:$0xff] %vm854_vm7, %v850_v33  ;;  %vm2334_vm8 = vcmask 60416  }
  0xe1   : > { %v965_v35 = vld [vmem:[#allocation2 + $0x1] ss:$2 sm:$0xff] }
  0xe2   : > { %v879_v34 = vld [vmem:[#allocation2] ss:$2 sm:$0xff]  ;;  %3524 = vmatprep.mubr.msk.f32.mxu1 %vm854_vm7, %v965_v35 }
  0xe3   : > { %3519 = vmatprep.mubr.msk.f32.mxu0 %vm854_vm7, %v879_v34  ;;  %v1052_v38 = vld [vmem:[#allocation2 + $0x2] ss:$2 sm:$0xff] }
  0xe4   : > { %1589 = vst.msk [vmem:[#allocation2] sm:$0xf] %vm1588_vm3, %v3714_v58 }
  0xe7   : > { %v880_v36 = vld [vmem:[#allocation2 + $0x10] ss:$2 sm:$0xff]  ;;  %v966_v37 = vld [vmem:[#allocation2 + $0x11] ss:$2 sm:$0xff] }
  0xe8   : > { %3520 = vmatmul.mubr.msk.f32.vlgmr.msra.gmra.mxu0 %vm854_vm7, %v880_v36  ;;  %3525 = vmatmul.mubr.msk.f32.vlgmr.msra.gmra.mxu1 %vm854_vm7, %v966_v37  ;;  %v1053_v42 = vld [vmem:[#allocation2 + $0x12] ss:$2 sm:$0xff]  ;;  %v1140_v43 = vld [vmem:[#allocation2 + $0x13] ss:$2 sm:$0xff] }
  0xe9   : > { %3528 = vmatpush3.msra.mxu0 %v3827_v44  ;;  %3529 = vmatprep.mubr.msk.f32.mxu0 %vm854_vm7, %v1052_v38  ;;  %v3338_v44 = vld [vmem:[%s4074_s4 + $0x30] sm:$0xff] }
  0xea   : > { %3534 = vmatprep.mubr.msk.f32.mxu1 %vm854_vm7, %v1139_v41  ;;  %3533 = vmatpush3.msra.mxu1 %v3833_v45  ;;  %v1313_v45 = vld [vmem:[#allocation2 + $0x5] ss:$2 sm:$0xff]  ;;  %v1227_v48 = vld [vmem:[#allocation2 + $0x14] ss:$2 sm:$0xff]  ;;  %v1314_v49 = vld [vmem:[#allocation2 + $0x15] ss:$2 sm:$0xff] }
  0xeb   : > { %3537 = vmatprep.subr.mxu0 %v3332_v39  ;;  %3542 = vmatprep.subr.mxu1 %v3335_v40  ;;  %v1400_v50 = vld [vmem:[#allocation2 + $0x6] ss:$2 sm:$0xff]  ;;  %v1487_v51 = vld [vmem:[#allocation2 + $0x7] ss:$2 sm:$0xff]  ;;  %v1401_v52 = vld [vmem:[#allocation2 + $0x16] ss:$2 sm:$0xff] }
  0xec   : > { %3530 = vmatmul.mubr.msk.f32.vlgmr.msra.gmra.mxu0 %vm854_vm7, %v1053_v42  ;;  %3535 = vmatmul.mubr.msk.f32.vlgmr.msra.gmra.mxu1 %vm854_vm7, %v1140_v43  ;;  %v1488_v53 = vld [vmem:[#allocation2 + $0x17] ss:$2 sm:$0xff] }
  0xed   : > { %3538 = vmatpush3.msra.mxu0 %v3332_v39  ;;  %3539 = vmatprep.mubr.msk.f32.mxu0 %vm854_vm7, %v1226_v46  ;;  %1593 = vst.msk [vmem:[#allocation2 + $0x14] sm:$0xf] %vm1588_vm3, %v3714_v58  ;;  %v3352_v39 = vld [vmem:[%s4077_s7 + $0x40] sm:$0xff]  ;;  %v3362_v42 = vld [vmem:[%s4077_s7 + $0x18] sm:$0xff] }
  0xee   : > { %3544 = vmatprep.mubr.msk.f32.mxu1 %vm854_vm7, %v1313_v45  ;;  %3543 = vmatpush3.msra.mxu1 %v3335_v40  ;;  %v3356_v41 = vld [vmem:[%s4077_s7 + $0x60] sm:$0xff]  ;;  %2340 = vst.msk [vmem:[#allocation2 + $0x24] sm:$0xf] %vm2334_vm8, %v3714_v58 }
  0xef   : > { %3547 = vmatprep.subr.mxu0 %v3338_v44  ;;  %3552 = vmatprep.subr.mxu1 %v3341_v47 }
  0xf0   : > { %3540 = vmatmul.mubr.msk.f32.vlgmr.msra.gmra.mxu0 %vm854_vm7, %v1227_v48  ;;  %3545 = vmatmul.mubr.msk.f32.vlgmr.msra.gmra.mxu1 %vm854_vm7, %v1314_v49  ;;  %v3365_v48 = vld [vmem:[%s4077_s7 + $0x30] sm:$0xff]  ;;  %v3370_v49 = vld [vmem:[%s4077_s7 + $0x58] sm:$0xff] }
  0xf1   : > { %3548 = vmatpush3.msra.mxu0 %v3338_v44  ;;  %3549 = vmatprep.mubr.msk.f32.mxu0 %vm854_vm7, %v1400_v50  ;;  %v3366_v44 = vld [vmem:[%s4077_s7 + $0x38] sm:$0xff] }
  0xf2   : > { %3554 = vmatprep.mubr.msk.f32.mxu1 %vm854_vm7, %v1487_v51  ;;  %3553 = vmatpush3.msra.mxu1 %v3341_v47  ;;  %v3361_v47 = vld [vmem:[%s4077_s7 + $0x10] sm:$0xff]  ;;  %v3374_v50 = vld [vmem:[%s4077_s7 + $0x78] sm:$0xff] }
  0xf3   : > { %3557 = vmatprep.subr.mxu0 %v1604_v54  ;;  %3564 = vmatprep.subr.mxu1 %v3349_v55  ;;  %v3369_v51 = vld [vmem:[%s4077_s7 + $0x50] sm:$0xff] }
  0xf4   : > { %3550 = vmatmul.mubr.msk.f32.vlgmr.msra.gmra.mxu0 %vm854_vm7, %v1401_v52  ;;  %3555 = vmatmul.mubr.msk.f32.vlgmr.msra.gmra.mxu1 %vm854_vm7, %v1488_v53  ;;  %v3373_v52 = vld [vmem:[%s4077_s7 + $0x70] sm:$0xff] }
  0xf5   : > { %3558 = vmatpush3.msra.mxu0 %v1604_v54  ;;  %3565 = vmatpush3.msra.mxu1 %v3349_v55  ;;  %v2352_v55 = vld [vmem:[%s4080_s10] sm:$0xff] }
  0xf6   : > { %3559 = vmatprep.subr.mxu0 %v1603_v56  ;;  %3566 = vmatprep.subr.mxu1 %v3348_v57 }
  0xf7   : > { %3560 = vmatpush3.msra.mxu0 %v1603_v56  ;;  %3567 = vmatpush3.msra.mxu1 %v3348_v57  ;;  %v3382_v56 = vld [vmem:[%s4080_s10 + $0x10] sm:$0xff]  ;;  %v3989_v57 = vld [vmem:[%s4080_s10 + $0x20] sm:$0xff] }
  0xf8   : > { %3571 = vmatprep.subr.mxu0 %v3353_v59  ;;  %3578 = vmatprep.subr.mxu1 %v3357_v62 }
 0x1a8   : > { %v3521_v63 = vpop.f32.mrf.mxu0  ;;  %v3526_v2 = vpop.f32.mrf.mxu1 }
 0x1a9   : > { %v964_v3 = vadd.f32 %v3521_v63, %v3320_v60 }
 0x1aa   : > { %v954_v61 = vpop.f32.mrf.mxu0  ;;  %v1041_v4 = vpop.f32.mrf.mxu1 }
 0x1ab   : > { %v1051_v5 = vadd.f32 %v3526_v2, %v964_v3  ;;  %v963_v6 = vadd.f32 %v3320_v60, %v954_v61 }
 0x1ac   : > { %v3531_v7 = vpop.f32.mrf.mxu0  ;;  %v3536_v0 = vpop.f32.mrf.mxu1 }
 0x1ad   : > { %v1050_v8 = vadd.f32 %v1041_v4, %v963_v6  ;;  %v1138_v9 = vadd.f32 %v3531_v7, %v1051_v5 }
 0x1ae   : > { %v1128_v10 = vpop.f32.mrf.mxu0  ;;  %v1215_v11 = vpop.f32.mrf.mxu1 }
 0x1af   : > { %v1225_v1 = vadd.f32 %v3536_v0, %v1138_v9  ;;  %v1137_v12 = vadd.f32 %v1128_v10, %v1050_v8  ;;  %v3360_v8 = vld [vmem:[%s4079_s9] ss:$0 sm:$0xff] }
 0x1b0   : > { %v3541_v14 = vpop.f32.mrf.mxu0  ;;  %v3546_v15 = vpop.f32.mrf.mxu1 }
 0x1b1   : > { %v1224_v16 = vadd.f32 %v1215_v11, %v1137_v12  ;;  %v1312_v13 = vadd.f32 %v3541_v14, %v1225_v1 }
 0x1b2   : > { %v1302_v17 = vpop.f32.mrf.mxu0  ;;  %v1389_v18 = vpop.f32.mrf.mxu1 }
 0x1b3   : > { %v1399_v19 = vadd.f32 %v3546_v15, %v1312_v13  ;;  %v1311_v20 = vadd.f32 %v1302_v17, %v1224_v16 }
 0x1b4   : > { %v3551_v21 = vpop.f32.mrf.mxu0  ;;  %v3556_v22 = vpop.f32.mrf.mxu1 }
 0x1b5   : > { %v1398_v23 = vadd.f32 %v1389_v18, %v1311_v20  ;;  %v1486_v24 = vadd.f32 %v3551_v21, %v1399_v19 }
 0x1b6   : > { %v1476_v26 = vpop.f32.mrf.mxu0  ;;  %v1563_v29 = vpop.f32.mrf.mxu1 }
 0x1b7   : > { %v1573_v27 = vadd.f32 %v3556_v22, %v1486_v24  ;;  %v1485_v28 = vadd.f32 %v1476_v26, %v1398_v23 }
 0x1b9   : > { %vm1575_vm4 = vcmp.ge.f32.partialorder %v1573_v27, 0.0  ;;  %v1583_v30 = vmul.f32 %v3344_v25, %v1573_v27  ;;  %v1572_v31 = vadd.f32 %v1563_v29, %v1485_v28 }
 0x1bb   : > { %v1585_v32 = vsel %vm1575_vm4, %v1573_v27, %v1583_v30  ;;  %vm1574_vm6 = vcmp.ge.f32.partialorder %v1572_v31, 0.0  ;;  %v1582_v33 = vmul.f32 %v3344_v25, %v1572_v31 }
 0x1bc   : > { %1592 = vst.msk [vmem:[#allocation2 + $0xc] sm:$0xff] %vm1590_vm5, %v1585_v32 }
 0x1bd   : > { %v1584_v34 = vsel %vm1574_vm6, %v1572_v31, %v1582_v33 }
 0x1be   : > { %1591 = vst.msk [vmem:[#allocation2 + $0x4] sm:$0xff] %vm1590_vm5, %v1584_v34 }
 0x1c3   : > { %v1602_v37 = vld [vmem:[#allocation2 + $0xe] sm:$0xff] }
 0x1c4   : > { %v1689_v38 = vld [vmem:[#allocation2 + $0xd] sm:$0xff] }
 0x1c5   : > { %v1601_v35 = vld [vmem:[#allocation2 + $0x6] sm:$0xff] }
 0x1c6   : > { %v1688_v36 = vld [vmem:[#allocation2 + $0x5] sm:$0xff]  ;;  %3561 = vmatprep.mubr.msk.f32.mxu0 %vm1590_vm5, %v1601_v35 }
 0x1c7   : > { %3568 = vmatprep.mubr.msk.f32.mxu1 %vm1590_vm5, %v1688_v36  ;;  %3562 = vmatmul.mubr.msk.f32.vlgmr.msra.gmra.mxu0 %vm1590_vm5, %v1602_v37  ;;  %v1776_v40 = vld [vmem:[#allocation2 + $0x4] sm:$0xff]  ;;  %v1777_v46 = vld [vmem:[#allocation2 + $0xc] sm:$0xff] }
 0x1c8   : > { %3569 = vmatmul.mubr.msk.f32.vlgmr.msra.gmra.mxu1 %vm1590_vm5, %v1689_v38  ;;  %3572 = vmatpush3.msra.mxu0 %v3353_v59  ;;  %v1864_v43 = vld [vmem:[#allocation2 + $0x3] sm:$0xff]  ;;  %v1865_v45 = vld [vmem:[#allocation2 + $0xb] sm:$0xff] }
 0x1c9   : > { %3575 = vmatprep.mubr.msk.f32.mxu0 %vm1590_vm5, %v1776_v40  ;;  %3573 = vmatprep.subr.mxu0 %v3352_v39  ;;  %v2232_v53 = vld [vmem:[#allocation2 + $0x2] sm:$0xff]  ;;  %v2233_v54 = vld [vmem:[#allocation2 + $0xa] sm:$0xff] }
 0x1ca   : > { %3579 = vmatpush3.msra.mxu1 %v3357_v62  ;;  %3582 = vmatprep.mubr.msk.f32.mxu1 %vm1590_vm5, %v1864_v43  ;;  %2335 = vst.msk [vmem:[#allocation2] sm:$0xf] %vm2334_vm8, %v3714_v58  ;;  %v3995_v59 = vld [vmem:[%s4080_s10 + $0x30] sm:$0xff]  ;;  %v3345_v58 = vld [vmem:[%s4078_s8] ss:$0 sm:$0xff] }
 0x1cb   : > { %3574 = vmatpush3.msra.mxu0 %v3352_v39  ;;  %3580 = vmatprep.subr.mxu1 %v3356_v41 }
 0x1cc   : > { %3585 = vmatprep.subr.mxu0 %v3362_v42  ;;  %3581 = vmatpush3.msra.mxu1 %v3356_v41 }
 0x1cd   : > { %3576 = vmatmul.mubr.msk.f32.vlgmr.msra.gmra.mxu0 %vm1590_vm5, %v1777_v46  ;;  %3583 = vmatmul.mubr.msk.f32.vlgmr.msra.gmra.mxu1 %vm1590_vm5, %v1865_v45 }
 0x1ce   : > { %3586 = vmatpush3.msra.mxu0 %v3362_v42  ;;  %3592 = vmatprep.subr.mxu1 %v3366_v44 }
 0x1cf   : > { %3587 = vmatprep.subr.mxu0 %v3361_v47  ;;  %3589 = vmatprep.mubr.msk.f32.mxu0 %vm1590_vm5, %v1688_v36 }
 0x1d0   : > { %3593 = vmatpush3.msra.mxu1 %v3366_v44  ;;  %3596 = vmatprep.mubr.msk.f32.mxu1 %vm1590_vm5, %v1776_v40 }
 0x1d1   : > { %3588 = vmatpush3.msra.mxu0 %v3361_v47  ;;  %3594 = vmatprep.subr.mxu1 %v3365_v48  ;;  %v3397_v47 = vld [vmem:[%s4080_s10 + $0x8] sm:$0xff] }
 0x1d2   : > { %3599 = vmatprep.subr.mxu0 %v3370_v49  ;;  %3595 = vmatpush3.msra.mxu1 %v3365_v48 }
 0x1d3   : > { %3590 = vmatmul.mubr.msk.f32.vlgmr.msra.gmra.mxu0 %vm1590_vm5, %v1689_v38  ;;  %3597 = vmatmul.mubr.msk.f32.vlgmr.msra.gmra.mxu1 %vm1590_vm5, %v1777_v46 }
 0x1d4   : > { %3600 = vmatpush3.msra.mxu0 %v3370_v49  ;;  %3606 = vmatprep.subr.mxu1 %v3374_v50 }
 0x1d5   : > { %3601 = vmatprep.subr.mxu0 %v3369_v51  ;;  %3603 = vmatprep.mubr.msk.f32.mxu0 %vm1590_vm5, %v1864_v43 }
 0x1d6   : > { %3607 = vmatpush3.msra.mxu1 %v3374_v50  ;;  %3610 = vmatprep.mubr.msk.f32.mxu1 %vm1590_vm5, %v2232_v53 }
 0x1d7   : > { %3602 = vmatpush3.msra.mxu0 %v3369_v51  ;;  %3608 = vmatprep.subr.mxu1 %v3373_v52 }
 0x1d8   : > { %3604 = vmatmul.mubr.msk.f32.vlgmr.msra.gmra.mxu0 %vm1590_vm5, %v1865_v45  ;;  %3609 = vmatpush3.msra.mxu1 %v3373_v52  ;;  %v3402_v45 = vld [vmem:[%s4080_s10 + $0x18] sm:$0xff] }
 0x1d9   : > { %3611 = vmatmul.mubr.msk.f32.vlgmr.msra.gmra.mxu1 %vm1590_vm5, %v2233_v54  ;;  %3613 = vmatprep.subr.mxu0 %v2352_v55 }
 0x1da   : > { %3621 = vmatprep.subr.mxu1 %v3382_v56  ;;  %3614 = vmatpush3.msra.mxu0 %v2352_v55 }
 0x1db   : > { %3622 = vmatpush3.msra.mxu1 %v3382_v56  ;;  %3629 = vmatprep.subr.mxu0 %v3989_v57  ;;  %v3407_v56 = vld [vmem:[%s4080_s10 + $0x28] sm:$0xff] }
 0x1dc   : > { %3637 = vmatprep.subr.mxu1 %v3995_v59 }
 0x287   : > { %v3563_v62 = vpop.f32.mrf.mxu0 }
 0x288   : > { %v3570_v60 = vpop.f32.mrf.mxu1  ;;  %v1687_v63 = vadd.f32 %v3563_v62, %v3345_v58 }
 0x289   : > { %v1677_v2 = vpop.f32.mrf.mxu0 }
 0x28a   : > { %v1765_v3 = vpop.f32.mrf.mxu1  ;;  %v1775_v61 = vadd.f32 %v3570_v60, %v1687_v63  ;;  %v1686_v4 = vadd.f32 %v3345_v58, %v1677_v2 }
 0x28c   : > { %v1774_v5 = vadd.f32 %v1765_v3, %v1686_v4 }
 0x28d   : > { %v3577_v6 = vpop.f32.mrf.mxu0  ;;  %v3584_v0 = vpop.f32.mrf.mxu1 }
 0x28e   : > { %v1863_v7 = vadd.f32 %v3577_v6, %v1775_v61  ;;  %v3377_v61 = vld [vmem:[#allocation4] ss:$0 sm:$0xff] }
 0x28f   : > { %v1853_v9 = vpop.f32.mrf.mxu0  ;;  %v1941_v1 = vpop.f32.mrf.mxu1 }
 0x290   : > { %v1951_v10 = vadd.f32 %v3584_v0, %v1863_v7  ;;  %v1862_v11 = vadd.f32 %v1853_v9, %v1774_v5 }
 0x292   : > { %vm1953_vm9 = vcmp.ge.f32.partialorder %v1951_v10, 0.0  ;;  %v1961_v12 = vmul.f32 %v3360_v8, %v1951_v10  ;;  %v1950_v14 = vadd.f32 %v1941_v1, %v1862_v11 }
 0x293   : > { %v3591_v15 = vpop.f32.mrf.mxu0  ;;  %v3598_v18 = vpop.f32.mrf.mxu1 }
 0x294   : > { %v1963_v16 = vsel %vm1953_vm9, %v1951_v10, %v1961_v12  ;;  %vm1952_vm10 = vcmp.ge.f32.partialorder %v1950_v14, 0.0  ;;  %v1960_v13 = vmul.f32 %v3360_v8, %v1950_v14  ;;  %v2055_v17 = vadd.f32 %v3591_v15, %v3345_v58 }
 0x295   : > { %1967 = vst [vmem:[#allocation3 + $0x11] ss:$2 sm:$0xff] %v1963_v16  ;;  %v2045_v19 = vpop.f32.mrf.mxu0  ;;  %v2133_v23 = vpop.f32.mrf.mxu1 }
 0x296   : > { %v1962_v20 = vsel %vm1952_vm10, %v1950_v14, %v1960_v13  ;;  %v2143_v21 = vadd.f32 %v3598_v18, %v2055_v17  ;;  %v2054_v22 = vadd.f32 %v3345_v58, %v2045_v19 }
 0x297   : > { %1965 = vst [vmem:[#allocation3 + $0x1] ss:$2 sm:$0xff] %v1962_v20 }
 0x298   : > { %v2142_v24 = vadd.f32 %v2133_v23, %v2054_v22  ;;  %v3605_v25 = vpop.f32.mrf.mxu0 }
 0x299   : > { %v2231_v26 = vadd.f32 %v3605_v25, %v2143_v21  ;;  %v3612_v27 = vpop.f32.mrf.mxu1 }
 0x29a   : > { %v2221_v28 = vpop.f32.mrf.mxu0 }
 0x29b   : > { %v2319_v29 = vadd.f32 %v3612_v27, %v2231_v26  ;;  %v2230_v30 = vadd.f32 %v2221_v28, %v2142_v24  ;;  %v2309_v31 = vpop.f32.mrf.mxu1 }
 0x29d   : > { %vm2321_vm11 = vcmp.ge.f32.partialorder %v2319_v29, 0.0  ;;  %v2323_v32 = vmul.f32 %v3360_v8, %v2319_v29  ;;  %v2318_v33 = vadd.f32 %v2309_v31, %v2230_v30 }
 0x29f   : > { %v2325_v34 = vsel %vm2321_vm11, %v2319_v29, %v2323_v32  ;;  %vm2320_vm12 = vcmp.ge.f32.partialorder %v2318_v33, 0.0  ;;  %v2322_v35 = vmul.f32 %v3360_v8, %v2318_v33 }
 0x2a0   : > { %2328 = vst [vmem:[#allocation3 + $0x10] ss:$2 sm:$0xff] %v2325_v34 }
 0x2a1   : > { %v2324_v36 = vsel %vm2320_vm12, %v2318_v33, %v2322_v35 }
 0x2a2   : > { %2326 = vst [vmem:[#allocation3] ss:$2 sm:$0xff] %v2324_v36 }
 0x2a7   : > { %v2331_v37 = vld [vmem:[#allocation3 + $0x10] sm:$0xff]  ;;  %v2332_v38 = vld [vmem:[#allocation3 + $0x18] sm:$0xff] }
 0x2a8   : > { %2338 = vst.msk [vmem:[#allocation2 + $0x14] sm:$0xff] %vm854_vm7, %v2331_v37  ;;  %2339 = vst.msk [vmem:[#allocation2 + $0x1c] sm:$0xff] %vm854_vm7, %v2332_v38 }
 0x2a9   : > { %v2329_v39 = vld [vmem:[#allocation3] sm:$0xff]  ;;  %v2330_v40 = vld [vmem:[#allocation3 + $0x8] sm:$0xff] }
 0x2aa   : > { %2336 = vst.msk [vmem:[#allocation2 + $0x4] sm:$0xff] %vm854_vm7, %v2329_v39  ;;  %2337 = vst.msk [vmem:[#allocation2 + $0xc] sm:$0xff] %vm854_vm7, %v2330_v40 }
 0x2af   : > { %v2350_v44 = vld [vmem:[#allocation2 + $0x16] sm:$0xff]  ;;  %v2351_v49 = vld [vmem:[#allocation2 + $0x1e] sm:$0xff] }
 0x2b0   : > { %v2456_v48 = vld [vmem:[#allocation2 + $0x15] sm:$0xff]  ;;  %v2457_v50 = vld [vmem:[#allocation2 + $0x1d] sm:$0xff] }
 0x2b1   : > { %v2348_v41 = vld [vmem:[#allocation2 + $0x6] sm:$0xff]  ;;  %v2349_v43 = vld [vmem:[#allocation2 + $0xe] sm:$0xff]  ;;  %v2564_v58 = vld [vmem:[#allocation2 + $0x1c] sm:$0xff] }
 0x2b2   : > { %v2454_v42 = vld [vmem:[#allocation2 + $0x5] sm:$0xff]  ;;  %3615 = vmatprep.mubr.msk.f32.mxu0 %vm854_vm7, %v2348_v41  ;;  %v2455_v46 = vld [vmem:[#allocation2 + $0xd] sm:$0xff]  ;;  %v2671_v62 = vld [vmem:[#allocation2 + $0x1b] sm:$0xff] }
 0x2b3   : > { %3623 = vmatprep.mubr.msk.f32.mxu1 %vm854_vm7, %v2454_v42  ;;  %3616 = vmatmul.mubr.msk.f32.vlgmr.msra.gmra.mxu0 %vm854_vm7, %v2349_v43  ;;  %v2561_v51 = vld [vmem:[#allocation2 + $0x4] sm:$0xff]  ;;  %v2562_v53 = vld [vmem:[#allocation2 + $0xc] sm:$0xff]  ;;  %v2563_v55 = vld [vmem:[#allocation2 + $0x14] sm:$0xff] }
 0x2b4   : > { %3624 = vmatmul.mubr.msk.f32.vlgmr.msra.gmra.mxu1 %vm854_vm7, %v2455_v46  ;;  %3630 = vmatpush3.msra.mxu0 %v3989_v57  ;;  %v2668_v52 = vld [vmem:[#allocation2 + $0x3] sm:$0xff]  ;;  %v2669_v54 = vld [vmem:[#allocation2 + $0xb] sm:$0xff]  ;;  %v3412_v57 = vld [vmem:[%s4080_s10 + $0x38] sm:$0xff] }
 0x2b5   : > { %3618 = vmatprep.mubr.msk.f32.mxu0 %vm854_vm7, %v2350_v44  ;;  %3626 = vmatprep.mubr.msk.f32.mxu1 %vm854_vm7, %v2456_v48  ;;  %v3106_v60 = vld [vmem:[#allocation2 + $0x2] sm:$0xff]  ;;  %v3107_v63 = vld [vmem:[#allocation2 + $0xa] sm:$0xff]  ;;  %v3108_v2 = vld [vmem:[#allocation2 + $0x12] sm:$0xff] }
 0x2b6   : > { %3638 = vmatpush3.msra.mxu1 %v3995_v59  ;;  %3645 = vmatprep.subr.mxu0 %v3397_v47  ;;  %v2670_v59 = vld [vmem:[#allocation2 + $0x13] sm:$0xff] }
 0x2b7   : > { %3653 = vmatprep.subr.mxu1 %v3402_v45  ;;  %3619 = vmatmul.mubr.msk.f32.gmra.mxu0 %vm854_vm7, %v2351_v49  ;;  %v3109_v3 = vld [vmem:[#allocation2 + $0x1a] sm:$0xff] }
 0x2b8   : > { %3627 = vmatmul.mubr.msk.f32.gmra.mxu1 %vm854_vm7, %v2457_v50  ;;  %3631 = vmatprep.mubr.msk.f32.mxu0 %vm854_vm7, %v2561_v51 }
 0x2b9   : > { %3639 = vmatprep.mubr.msk.f32.mxu1 %vm854_vm7, %v2668_v52 }
 0x2bb   : > { %3632 = vmatmul.mubr.msk.f32.vlgmr.msra.gmra.mxu0 %vm854_vm7, %v2562_v53 }
 0x2bc   : > { %3640 = vmatmul.mubr.msk.f32.vlgmr.msra.gmra.mxu1 %vm854_vm7, %v2669_v54  ;;  %3646 = vmatpush3.msra.mxu0 %v3397_v47 }
 0x2bd   : > { %3634 = vmatprep.mubr.msk.f32.mxu0 %vm854_vm7, %v2563_v55  ;;  %3642 = vmatprep.mubr.msk.f32.mxu1 %vm854_vm7, %v2670_v59 }
 0x2be   : > { %3654 = vmatpush3.msra.mxu1 %v3402_v45  ;;  %3661 = vmatprep.subr.mxu0 %v3407_v56 }
 0x2bf   : > { %3669 = vmatprep.subr.mxu1 %v3412_v57  ;;  %3635 = vmatmul.mubr.msk.f32.gmra.mxu0 %vm854_vm7, %v2564_v58 }
 0x2c0   : > { %3643 = vmatmul.mubr.msk.f32.gmra.mxu1 %vm854_vm7, %v2671_v62  ;;  %3647 = vmatprep.mubr.msk.f32.mxu0 %vm854_vm7, %v2454_v42 }
 0x2c1   : > { %3655 = vmatprep.mubr.msk.f32.mxu1 %vm854_vm7, %v2561_v51 }
 0x2c3   : > { %3648 = vmatmul.mubr.msk.f32.vlgmr.msra.gmra.mxu0 %vm854_vm7, %v2455_v46 }
 0x2c4   : > { %3656 = vmatmul.mubr.msk.f32.vlgmr.msra.gmra.mxu1 %vm854_vm7, %v2562_v53  ;;  %3662 = vmatpush3.msra.mxu0 %v3407_v56 }
 0x2c5   : > { %3650 = vmatprep.mubr.msk.f32.mxu0 %vm854_vm7, %v2456_v48  ;;  %3658 = vmatprep.mubr.msk.f32.mxu1 %vm854_vm7, %v2563_v55 }
 0x2c6   : > { %3670 = vmatpush3.msra.mxu1 %v3412_v57 }
 0x2c7   : > { %3651 = vmatmul.mubr.msk.f32.gmra.mxu0 %vm854_vm7, %v2457_v50 }
 0x2c8   : > { %3659 = vmatmul.mubr.msk.f32.gmra.mxu1 %vm854_vm7, %v2564_v58  ;;  %3663 = vmatprep.mubr.msk.f32.mxu0 %vm854_vm7, %v2668_v52 }
 0x2c9   : > { %3671 = vmatprep.mubr.msk.f32.mxu1 %vm854_vm7, %v3106_v60 }
 0x2cb   : > { %3664 = vmatmul.mubr.msk.f32.vlgmr.msra.gmra.mxu0 %vm854_vm7, %v2669_v54 }
 0x2cc   : > { %3672 = vmatmul.mubr.msk.f32.vlgmr.msra.gmra.mxu1 %vm854_vm7, %v3107_v63  ;;  %3666 = vmatprep.mubr.msk.f32.mxu0 %vm854_vm7, %v2670_v59 }
 0x2cd   : > { %3674 = vmatprep.mubr.msk.f32.mxu1 %vm854_vm7, %v3108_v2 }
 0x2cf   : > { %3667 = vmatmul.mubr.msk.f32.gmra.mxu0 %vm854_vm7, %v2671_v62 }
 0x2d0   : > { %3675 = vmatmul.mubr.msk.f32.gmra.mxu1 %vm854_vm7, %v3109_v3 }
 0x373   : > { %v3617_v4 = vpop.f32.mrf.mxu0 }
 0x374   : > { %v3625_v5 = vpop.f32.mrf.mxu1  ;;  %v2451_v0 = vadd.f32 %v3617_v4, %v3377_v61 }
 0x375   : > { %v2431_v6 = vpop.f32.mrf.mxu0 }
 0x376   : > { %v2538_v7 = vpop.f32.mrf.mxu1  ;;  %v2450_v10 = vadd.f32 %v3377_v61, %v2431_v6  ;;  %v2558_v12 = vadd.f32 %v3625_v5, %v2451_v0 }
 0x377   : > { %v3620_v8 = vpop.f32.mrf.mxu0 }
 0x378   : > { %v3628_v9 = vpop.f32.mrf.mxu1  ;;  %v2453_v14 = vadd.f32 %v3620_v8, %v3377_v61  ;;  %v2557_v13 = vadd.f32 %v2538_v7, %v2450_v10 }
 0x379   : > { %v2441_v11 = vpop.f32.mrf.mxu0 }
 0x37a   : > { %v2548_v1 = vpop.f32.mrf.mxu1  ;;  %v2452_v17 = vadd.f32 %v3377_v61, %v2441_v11  ;;  %v2560_v21 = vadd.f32 %v3628_v9, %v2453_v14 }
 0x37b   : > { %v3633_v15 = vpop.f32.mrf.mxu0 }
 0x37c   : > { %v3641_v16 = vpop.f32.mrf.mxu1  ;;  %v2665_v18 = vadd.f32 %v3633_v15, %v2558_v12  ;;  %v2559_v26 = vadd.f32 %v2548_v1, %v2452_v17 }
 0x37d   : > { %v2645_v19 = vpop.f32.mrf.mxu0 }
 0x37e   : > { %v2752_v20 = vpop.f32.mrf.mxu1  ;;  %v2772_v22 = vadd.f32 %v3641_v16, %v2665_v18  ;;  %v2664_v23 = vadd.f32 %v2645_v19, %v2557_v13 }
 0x37f   : > { %v3636_v24 = vpop.f32.mrf.mxu0 }
 0x380   : > { %v3644_v25 = vpop.f32.mrf.mxu1  ;;  %3689 = vtanh.f32 %v2772_v22  ;;  %v2771_v27 = vadd.f32 %v2752_v20, %v2664_v23  ;;  %v2667_v28 = vadd.f32 %v3636_v24, %v2560_v21 }
 0x381   : > { %v2655_v29 = vpop.f32.mrf.mxu0 }
 0x382   : > { %v2762_v30 = vpop.f32.mrf.mxu1  ;;  %3691 = vtanh.f32 %v2771_v27  ;;  %v2774_v31 = vadd.f32 %v3644_v25, %v2667_v28  ;;  %v2666_v32 = vadd.f32 %v2655_v29, %v2559_v26 }
 0x383   : > { %v3649_v33 = vpop.f32.mrf.mxu0 }
 0x384   : > { %v3657_v34 = vpop.f32.mrf.mxu1  ;;  %3693 = vtanh.f32 %v2774_v31  ;;  %v2773_v35 = vadd.f32 %v2762_v30, %v2666_v32  ;;  %v2889_v38 = vadd.f32 %v3649_v33, %v3377_v61 }
 0x385   : > { %v2869_v36 = vpop.f32.mrf.mxu0 }
 0x386   : > { %v2976_v37 = vpop.f32.mrf.mxu1  ;;  %3695 = vtanh.f32 %v2773_v35  ;;  %v2888_v41 = vadd.f32 %v3377_v61, %v2869_v36  ;;  %v2996_v46 = vadd.f32 %v3657_v34, %v2889_v38 }
 0x387   : > { %v3652_v39 = vpop.f32.mrf.mxu0 }
 0x388   : > { %v3660_v40 = vpop.f32.mrf.mxu1  ;;  %v2891_v44 = vadd.f32 %v3652_v39, %v3377_v61  ;;  %v2995_v48 = vadd.f32 %v2976_v37, %v2888_v41 }
 0x389   : > { %v2879_v42 = vpop.f32.mrf.mxu0 }
 0x38a   : > { %v2986_v43 = vpop.f32.mrf.mxu1  ;;  %v2890_v49 = vadd.f32 %v3377_v61, %v2879_v42  ;;  %v2998_v54 = vadd.f32 %v3660_v40, %v2891_v44 }
 0x38b   : > { %v3665_v47 = vpop.f32.mrf.mxu0 }
 0x38c   : > { %v3673_v45 = vpop.f32.mrf.mxu1  ;;  %v3103_v50 = vadd.f32 %v3665_v47, %v2996_v46  ;;  %v2997_v62 = vadd.f32 %v2986_v43, %v2890_v49 }
 0x38d   : > { %v3690_v51 = vpop.eup %3689  ;;  %v3083_v52 = vpop.f32.mrf.mxu0 }
 0x38e   : > { %v3190_v53 = vpop.f32.mrf.mxu1  ;;  %2780 = vst [vmem:[#allocation3 + $0x11] ss:$2 sm:$0xff] %v3690_v51  ;;  %v3210_v55 = vadd.f32 %v3673_v45, %v3103_v50  ;;  %v3102_v56 = vadd.f32 %v3083_v52, %v2995_v48 }
 0x38f   : > { %v3692_v57 = vpop.eup %3691  ;;  %v3668_v59 = vpop.f32.mrf.mxu0 }
 0x390   : > { %v3676_v58 = vpop.f32.mrf.mxu1  ;;  %2779 = vst [vmem:[#allocation3 + $0x1] ss:$2 sm:$0xff] %v3692_v57  ;;  %3697 = vtanh.f32 %v3210_v55  ;;  %v3209_v60 = vadd.f32 %v3190_v53, %v3102_v56  ;;  %v3105_v63 = vadd.f32 %v3668_v59, %v2998_v54 }
 0x391   : > { %v3694_v2 = vpop.eup %3693  ;;  %v3093_v3 = vpop.f32.mrf.mxu0 }
 0x392   : > { %2784 = vst [vmem:[#allocation3 + $0x31] ss:$2 sm:$0xff] %v3694_v2  ;;  %3699 = vtanh.f32 %v3209_v60  ;;  %v3212_v61 = vadd.f32 %v3676_v58, %v3105_v63  ;;  %v3104_v4 = vadd.f32 %v3093_v3, %v2997_v62  ;;  %v3200_v6 = vpop.f32.mrf.mxu1 }
 0x393   : > { %v3696_v5 = vpop.eup %3695 }
 0x394   : > { %2782 = vst [vmem:[#allocation3 + $0x21] ss:$2 sm:$0xff] %v3696_v5  ;;  %3701 = vtanh.f32 %v3212_v61  ;;  %v3211_v7 = vadd.f32 %v3200_v6, %v3104_v4 }
 0x396   : > { %3703 = vtanh.f32 %v3211_v7 }
 0x39d   : > { %v3698_v0 = vpop.eup %3697 }
 0x39e   : > { %3218 = vst [vmem:[#allocation3 + $0x10] ss:$2 sm:$0xff] %v3698_v0 }
 0x39f   : > { %v3700_v8 = vpop.eup %3699 }
 0x3a0   : > { %3217 = vst [vmem:[#allocation3] ss:$2 sm:$0xff] %v3700_v8 }
 0x3a1   : > { %v3702_v9 = vpop.eup %3701 }
 0x3a2   : > { %3222 = vst [vmem:[#allocation3 + $0x30] ss:$2 sm:$0xff] %v3702_v9 }
 0x3a3   : > { %v3704_v10 = vpop.eup %3703 }
 0x3a4   : > { %3220 = vst [vmem:[#allocation3 + $0x20] ss:$2 sm:$0xff] %v3704_v10 }
 0x3a5   : > { %v3225_v11 = vld [vmem:[#allocation3 + $0x10] sm:$0xff]  ;;  %v3226_v1 = vld [vmem:[#allocation3 + $0x18] sm:$0xff] }
 0x3a6   : > { %3233 = vst.msk [vmem:[%s444_s29 + $0x10] sm:$0xff] %vm455_vm0, %v3225_v11  ;;  %3234 = vst.msk [vmem:[%s444_s29 + $0x18] sm:$0xff] %vm455_vm0, %v3226_v1 }
 0x3a7   : > { %v3223_v12 = vld [vmem:[#allocation3] sm:$0xff]  ;;  %v3224_v14 = vld [vmem:[#allocation3 + $0x8] sm:$0xff] }
 0x3a8   : > { %3231 = vst.msk [vmem:[%s444_s29] sm:$0xff] %vm455_vm0, %v3223_v12  ;;  %3232 = vst.msk [vmem:[%s444_s29 + $0x8] sm:$0xff] %vm455_vm0, %v3224_v14 }
 0x3a9   : > { %v3229_v15 = vld [vmem:[#allocation3 + $0x30] sm:$0xff]  ;;  %v3230_v16 = vld [vmem:[#allocation3 + $0x38] sm:$0xff] }
 0x3aa   : > { %3237 = vst.msk [vmem:[%s444_s29 + $0x30] sm:$0xff] %vm455_vm0, %v3229_v15  ;;  %3238 = vst.msk [vmem:[%s444_s29 + $0x38] sm:$0xff] %vm455_vm0, %v3230_v16 }
 0x3ab   : > { %v3227_v13 = vld [vmem:[#allocation3 + $0x20] sm:$0xff]  ;;  %v3228_v17 = vld [vmem:[#allocation3 + $0x28] sm:$0xff] }
 0x3ac   : > { %3235 = vst.msk [vmem:[%s444_s29 + $0x20] sm:$0xff] %vm455_vm0, %v3227_v13  ;;  %3236 = vst.msk [vmem:[%s444_s29 + $0x28] sm:$0xff] %vm455_vm0, %v3228_v17 }
 0x3ad PF: > { %s27_s27 = sadd.s32 1, %s3711_s27  }
 0x3ae   : > { %p24_p4 = scmp.ge.s32.totalorder %s27_s27, 4  }
 0x3b0   :  { %26 = sbr.rel (!%p24_p4) target bundleno = 3 (0x3), region = 168 }

</bundles_post_ra>
